<compile_context>
chip_gen: v7x
topology: tpu7x:2x2x1
jax: 0.10.0
libtpu: 0.0.40
codegen_flags: <defaults>
</compile_context>

<pallas_src>
import functools

import jax
import jax.numpy as jnp
from jax.experimental import pallas as pl
from jax.experimental.pallas import tpu as pltpu


_SQRT1_2 = 0.7071067811865476


def _erf(x):
    """Abramowitz & Stegun 7.1.26 rational erf approximation, |err| < 1.5e-7 (f32)."""
    p = 0.3275911
    a1, a2, a3, a4, a5 = (0.254829592, -0.284496736, 1.421413741,
                          -1.453152027, 1.061405429)
    ax = jnp.abs(x)
    t = 1.0 / (1.0 + p * ax)
    poly = ((((a5 * t + a4) * t + a3) * t + a2) * t + a1) * t
    y = 1.0 - poly * jnp.exp(-ax * ax)
    return jnp.where(x < 0.0, -y, y)


# ---------------------------------------------------------------------------
# Fused transformer-block kernel: one grid step == one batch element (N, C).
# ---------------------------------------------------------------------------
def _block_kernel(x_ref, g1_ref, wqkv_ref, bqkv_ref, wo_ref, bo_ref,
                  g2_ref, w1_ref, b1_ref, w2_ref, b2_ref, y_ref,
                  *, eps, C):
    bf16 = jnp.bfloat16
    x = x_ref[...]                                             # (N, C) f32

    # ---- RMSNorm 1 (f32 stats, rsqrt on EUP) ----
    h = x * jax.lax.rsqrt(jnp.mean(x * x, axis=-1, keepdims=True) + eps)
    h = (h * g1_ref[...]).astype(bf16)

    # ---- fused QKV projection (attention scale pre-folded into q columns) ----
    qkv = jnp.dot(h, wqkv_ref[...],
                  preferred_element_type=jnp.float32) + bqkv_ref[...]
    q = qkv[:, :C].astype(bf16)
    k = qkv[:, C:2 * C].astype(bf16)
    v = qkv[:, 2 * C:].astype(bf16)
    # RoPE is the identity for num_heads == 1 (pos = [0] => cos=1, sin=0).

    # ---- scaled dot-product attention (single head, one batch) ----
    s = jax.lax.dot_general(q, k, (((1,), (1,)), ((), ())),
                            preferred_element_type=jnp.float32)   # (N, N)
    s = s - jnp.max(s, axis=-1, keepdims=True)
    p_ = jnp.exp(s)
    # NOTE: approx reciprocal (EUP vrcp) => ~1e-3 rel. error vs exact softmax.
    p_ = p_ * pl.reciprocal(jnp.sum(p_, axis=-1, keepdims=True), approx=True)
    o = jnp.dot(p_.astype(bf16), v, preferred_element_type=jnp.float32)

    # ---- output projection + first residual ----
    xr = x + (jnp.dot(o.astype(bf16), wo_ref[...],
                      preferred_element_type=jnp.float32) + bo_ref[...])

    # ---- RMSNorm 2 + fc1 ----
    h2 = xr * jax.lax.rsqrt(jnp.mean(xr * xr, axis=-1, keepdims=True) + eps)
    h2 = (h2 * g2_ref[...]).astype(bf16)
    pre = jnp.dot(h2, w1_ref[...],
                  preferred_element_type=jnp.float32) + b1_ref[...]

    # ---- erf-GELU in bf16 (largest elementwise tensor: (N, Dh)) ----
    pre_b = pre.astype(bf16)
    act = (0.5 * pre_b) * (1.0 + _erf(pre_b * _SQRT1_2))

    # ---- fc2 + second residual ----
    y_ref[...] = xr + (jnp.dot(act.astype(bf16), w2_ref[...],
                               preferred_element_type=jnp.float32) + b2_ref[...])


# ---------------------------------------------------------------------------
# Wrapper: grid over batch, weights resident (constant index_map).
# ---------------------------------------------------------------------------
def transformer_block(x, kp, *, eps=1e-6):
    B, N, C = x.shape
    Dh = kp["w1"].shape[1]
    xf = x.reshape(B * N, C)                      # contiguous, free reshape

    def per_batch(shape):                         # x / y tiles, one batch each
        return pl.BlockSpec(shape, lambda b: (b, 0))

    def resident(shape):                          # weights: same block every step
        nd = len(shape)
        return pl.BlockSpec(shape, lambda b, _n=nd: (0,) * _n)

    kernel = functools.partial(_block_kernel, eps=eps, C=C)
    y = pl.pallas_call(
        kernel,
        grid=(B,),
        in_specs=[per_batch((N, C)),                       # x
                  resident((1, C)),                        # g1
                  resident((C, 3 * C)), resident((1, 3 * C)),  # wqkv, bqkv
                  resident((C, C)), resident((1, C)),          # wo, bo
                  resident((1, C)),                        # g2
                  resident((C, Dh)), resident((1, Dh)),        # w1, b1
                  resident((Dh, C)), resident((1, C))],        # w2, b2
        out_specs=per_batch((N, C)),
        out_shape=jax.ShapeDtypeStruct((B * N, C), jnp.float32),
        compiler_params=pltpu.CompilerParams(dimension_semantics=("parallel",)),
    )(xf, kp["g1"], kp["wqkv"], kp["bqkv"], kp["wo"], kp["bo"],
      kp["g2"], kp["w1"], kp["b1"], kp["w2"], kp["b2"])
    return y.reshape(B, N, C)


# ---------------------------------------------------------------------------
# One-time parameter prep (OUTSIDE the hot call path):
#   * cast weight matrices to bf16 once,
#   * fold the attention scale into wqkv's q-columns AND bqkv's q-portion.
# ---------------------------------------------------------------------------
def prepare_params(p):
    C = p["wo"].shape[0]
    scale = float(C) ** -0.5          # head_dim == C since num_heads == 1
    bf16 = jnp.bfloat16
    col_scale = jnp.concatenate(
        [jnp.full((1, C), scale, jnp.float32),
         jnp.ones((1, 2 * C), jnp.float32)], axis=1)
    return dict(
        g1=p["g1"], g2=p["g2"],
        wqkv=(p["wqkv"] * col_scale).astype(bf16),
        bqkv=p["bqkv"] * col_scale,                 # bias q-portion scaled too
        wo=p["wo"].astype(bf16), bo=p["bo"],
        w1=p["w1"].astype(bf16), b1=p["b1"],
        w2=p["w2"].astype(bf16), b2=p["b2"],
    )


# ---------------------------------------------------------------------------
# Deterministic parameter init (shapes from the module's __init__), f32.
# ---------------------------------------------------------------------------
def init_params(key, embed_dim, mlp_ratio=4.0):
    C = embed_dim
    Dh = int(C * mlp_ratio)
    ks = jax.random.split(key, 8)
    f = lambda k, s: 0.02 * jax.random.normal(k, s, jnp.float32)
    return dict(
        g1=jnp.ones((1, C), jnp.float32) + f(ks[0], (1, C)),
        g2=jnp.ones((1, C), jnp.float32) + f(ks[1], (1, C)),
        wqkv=f(ks[2], (C, 3 * C)), bqkv=f(ks[3], (1, 3 * C)),   # packed [q|k|v]
        wo=f(ks[4], (C, C)), bo=f(ks[5], (1, C)),
        w1=f(ks[6], (C, Dh)), b1=jnp.zeros((1, Dh), jnp.float32),
        w2=f(ks[7], (Dh, C)), b2=jnp.zeros((1, C), jnp.float32),
    )


# ---------------------------------------------------------------------------
# Pure-JAX f32 reference (same bug-faithful RoPE) for a sanity check.
# ---------------------------------------------------------------------------
def reference_block(x, p, eps=1e-6):
    B, N, C = x.shape
    half = C // 2
    scale = float(C) ** -0.5

    def rms(t, g):
        return t / jnp.sqrt(jnp.mean(t * t, -1, keepdims=True) + eps) * g

    # RoPE exactly as the PyTorch module builds it: pos = arange(num_heads) = [0]
    # => sin = 0, cos = 1 (identity rotation), applied explicitly here.
    freqs = jnp.arange(half, dtype=jnp.float32)
    inv_freq = 1.0 / (10000.0 ** (freqs / half))
    pos = jnp.arange(1, dtype=jnp.float32)
    sinus = jnp.einsum("i,j->ij", pos, inv_freq)
    cos, sin = jnp.cos(sinus), jnp.sin(sinus)

    def rope(t):
        t1, t2 = t[..., :half], t[..., half:]
        return jnp.concatenate([t1 * cos - t2 * sin, t1 * sin + t2 * cos], -1)

    h = rms(x, p["g1"])
    qkv = h @ p["wqkv"] + p["bqkv"]
    q, k, v = qkv[..., :C], qkv[..., C:2 * C], qkv[..., 2 * C:]
    q, k = rope(q), rope(k)
    att = jax.nn.softmax(jnp.einsum("bnc,bmc->bnm", q, k) * scale, axis=-1)
    o = jnp.einsum("bnm,bmc->bnc", att, v) @ p["wo"] + p["bo"]
    x = x + o
    h2 = rms(x, p["g2"])
    ff = jax.nn.gelu(h2 @ p["w1"] + p["b1"], approximate=False) @ p["w2"] + p["b2"]
    return x + ff


if __name__ == "__main__":
    B, N, C = 2, 32, 128        # num_heads=1: only config where the ref RoPE is valid
    key = jax.random.PRNGKey(0)
    kx, kp = jax.random.split(key)
    x = jax.random.normal(kx, (B, N, C), jnp.float32)
    params = init_params(kp, C, mlp_ratio=4.0)
    kernel_params = prepare_params(params)          # one-time prep (bf16 + scale fold)

    y = transformer_block(x, kernel_params)
    y = jax.block_until_ready(y)

    assert y.shape == (B, N, C) and y.dtype == jnp.float32
    y_ref = reference_block(x, params)
    assert bool(jnp.all(jnp.isfinite(y)))
    assert bool(jnp.allclose(y, y_ref, atol=2e-2, rtol=2e-2)), "mismatch vs JAX reference"
    print("KERNEL_OK")
</pallas_src>

<mosaic_0001>
module attributes {stable_mosaic.version = 11 : i64} {
  func.func @_block_kernel(%arg0: i32, %arg1: memref<32x128xf32, #tpu.memory_space<vmem>>, %arg2: memref<1x128xf32, #tpu.memory_space<vmem>>, %arg3: memref<128x384xbf16, #tpu.memory_space<vmem>>, %arg4: memref<1x384xf32, #tpu.memory_space<vmem>>, %arg5: memref<128x128xbf16, #tpu.memory_space<vmem>>, %arg6: memref<1x128xf32, #tpu.memory_space<vmem>>, %arg7: memref<1x128xf32, #tpu.memory_space<vmem>>, %arg8: memref<128x512xbf16, #tpu.memory_space<vmem>>, %arg9: memref<1x512xf32, #tpu.memory_space<vmem>>, %arg10: memref<512x128xbf16, #tpu.memory_space<vmem>>, %arg11: memref<1x128xf32, #tpu.memory_space<vmem>>, %arg12: memref<32x128xf32, #tpu.memory_space<vmem>>) attributes {dimension_semantics = [#tpu.dimension_semantics<parallel>], iteration_bounds = array<i64: 2>, scalar_prefetch = 0 : i64, scratch_operands = 0 : i64, tpu.core_type = #tpu.core_type<tc>, window_params = [{transform_indices = @transform_0, window_bounds = array<i64: 32, 128>}, {pipeline_mode = #tpu.pipeline_mode<synchronous>, transform_indices = @transform_1, window_bounds = array<i64: 1, 128>}, {pipeline_mode = #tpu.pipeline_mode<synchronous>, transform_indices = @transform_2, window_bounds = array<i64: 128, 384>}, {pipeline_mode = #tpu.pipeline_mode<synchronous>, transform_indices = @transform_3, window_bounds = array<i64: 1, 384>}, {pipeline_mode = #tpu.pipeline_mode<synchronous>, transform_indices = @transform_4, window_bounds = array<i64: 128, 128>}, {pipeline_mode = #tpu.pipeline_mode<synchronous>, transform_indices = @transform_5, window_bounds = array<i64: 1, 128>}, {pipeline_mode = #tpu.pipeline_mode<synchronous>, transform_indices = @transform_6, window_bounds = array<i64: 1, 128>}, {pipeline_mode = #tpu.pipeline_mode<synchronous>, transform_indices = @transform_7, window_bounds = array<i64: 128, 512>}, {pipeline_mode = #tpu.pipeline_mode<synchronous>, transform_indices = @transform_8, window_bounds = array<i64: 1, 512>}, {pipeline_mode = #tpu.pipeline_mode<synchronous>, transform_indices = @transform_9, window_bounds = array<i64: 512, 128>}, {pipeline_mode = #tpu.pipeline_mode<synchronous>, transform_indices = @transform_10, window_bounds = array<i64: 1, 128>}, {transform_indices = @transform_11, window_bounds = array<i64: 32, 128>}]} {
    %c0 = arith.constant 0 : index
    %c0_0 = arith.constant 0 : index
    %0 = vector.load %arg1[%c0, %c0_0] : memref<32x128xf32, #tpu.memory_space<vmem>>, vector<32x128xf32>
    %1 = arith.mulf %0, %0 : vector<32x128xf32>
    %cst = arith.constant dense<0.000000e+00> : vector<32xf32>
    %2 = vector.multi_reduction <add>, %1, %cst [1] : vector<32x128xf32> to vector<32xf32>
    %3 = vector.shape_cast %2 : vector<32xf32> to vector<32x1xf32>
    %cst_1 = arith.constant 1.280000e+02 : f32
    %4 = vector.broadcast %cst_1 : f32 to vector<32x1xf32>
    %5 = arith.divf %3, %4 : vector<32x1xf32>
    %cst_2 = arith.constant 9.99999997E-7 : f32
    %6 = vector.broadcast %cst_2 : f32 to vector<32x1xf32>
    %7 = arith.addf %5, %6 : vector<32x1xf32>
    %8 = math.rsqrt %7 : vector<32x1xf32>
    %9 = vector.broadcast %8 : vector<32x1xf32> to vector<32x128xf32>
    %10 = arith.mulf %0, %9 : vector<32x128xf32>
    %c0_3 = arith.constant 0 : index
    %c0_4 = arith.constant 0 : index
    %11 = vector.load %arg2[%c0_3, %c0_4] : memref<1x128xf32, #tpu.memory_space<vmem>>, vector<1x128xf32>
    %12 = vector.broadcast %11 : vector<1x128xf32> to vector<32x128xf32>
    %13 = arith.mulf %10, %12 : vector<32x128xf32>
    %14 = arith.truncf %13 : vector<32x128xf32> to vector<32x128xbf16>
    %c0_5 = arith.constant 0 : index
    %c0_6 = arith.constant 0 : index
    %15 = vector.load %arg3[%c0_5, %c0_6] : memref<128x384xbf16, #tpu.memory_space<vmem>>, vector<128x384xbf16>
    %cst_7 = arith.constant dense<0.000000e+00> : vector<32x384xf32>
    %16 = tpu.matmul %14, %15, %cst_7 {dimension_numbers = #tpu.dot_dimension_numbers<[1], [0], [0], [1], [0, 0, 1, 1], [], []>} : vector<32x128xbf16>, vector<128x384xbf16>, vector<32x384xf32> -> vector<32x384xf32>
    %c0_8 = arith.constant 0 : index
    %c0_9 = arith.constant 0 : index
    %17 = vector.load %arg4[%c0_8, %c0_9] : memref<1x384xf32, #tpu.memory_space<vmem>>, vector<1x384xf32>
    %18 = vector.broadcast %17 : vector<1x384xf32> to vector<32x384xf32>
    %19 = arith.addf %16, %18 : vector<32x384xf32>
    %20 = vector.extract_strided_slice %19 {offsets = [0, 0], sizes = [32, 128], strides = [1, 1]} : vector<32x384xf32> to vector<32x128xf32>
    %21 = arith.truncf %20 : vector<32x128xf32> to vector<32x128xbf16>
    %22 = vector.extract_strided_slice %19 {offsets = [0, 128], sizes = [32, 128], strides = [1, 1]} : vector<32x384xf32> to vector<32x128xf32>
    %23 = arith.truncf %22 : vector<32x128xf32> to vector<32x128xbf16>
    %24 = vector.extract_strided_slice %19 {offsets = [0, 256], sizes = [32, 128], strides = [1, 1]} : vector<32x384xf32> to vector<32x128xf32>
    %25 = arith.truncf %24 : vector<32x128xf32> to vector<32x128xbf16>
    %cst_10 = arith.constant dense<0.000000e+00> : vector<32x32xf32>
    %26 = tpu.matmul %21, %23, %cst_10 {dimension_numbers = #tpu.dot_dimension_numbers<[1], [1], [0], [0], [0, 0, 1, 0], [], []>} : vector<32x128xbf16>, vector<32x128xbf16>, vector<32x32xf32> -> vector<32x32xf32>
    %cst_11 = arith.constant dense<0xFF800000> : vector<32xf32>
    %27 = vector.multi_reduction <maximumf>, %26, %cst_11 [1] : vector<32x32xf32> to vector<32xf32>
    %28 = vector.shape_cast %27 : vector<32xf32> to vector<32x1xf32>
    %29 = vector.broadcast %28 : vector<32x1xf32> to vector<32x32xf32>
    %30 = arith.subf %26, %29 : vector<32x32xf32>
    %31 = math.exp %30 : vector<32x32xf32>
    %cst_12 = arith.constant dense<0.000000e+00> : vector<32xf32>
    %32 = vector.multi_reduction <add>, %31, %cst_12 [1] : vector<32x32xf32> to vector<32xf32>
    %33 = vector.shape_cast %32 : vector<32xf32> to vector<32x1xf32>
    %34 = tpu.reciprocal %33 {approx = true} : vector<32x1xf32> -> vector<32x1xf32>
    %35 = vector.broadcast %34 : vector<32x1xf32> to vector<32x32xf32>
    %36 = arith.mulf %31, %35 : vector<32x32xf32>
    %37 = arith.truncf %36 : vector<32x32xf32> to vector<32x32xbf16>
    %cst_13 = arith.constant dense<0.000000e+00> : vector<32x128xf32>
    %38 = tpu.matmul %37, %25, %cst_13 {dimension_numbers = #tpu.dot_dimension_numbers<[1], [0], [0], [1], [0, 0, 1, 1], [], []>} : vector<32x32xbf16>, vector<32x128xbf16>, vector<32x128xf32> -> vector<32x128xf32>
    %39 = arith.truncf %38 : vector<32x128xf32> to vector<32x128xbf16>
    %c0_14 = arith.constant 0 : index
    %c0_15 = arith.constant 0 : index
    %40 = vector.load %arg5[%c0_14, %c0_15] : memref<128x128xbf16, #tpu.memory_space<vmem>>, vector<128x128xbf16>
    %cst_16 = arith.constant dense<0.000000e+00> : vector<32x128xf32>
    %41 = tpu.matmul %39, %40, %cst_16 {dimension_numbers = #tpu.dot_dimension_numbers<[1], [0], [0], [1], [0, 0, 1, 1], [], []>} : vector<32x128xbf16>, vector<128x128xbf16>, vector<32x128xf32> -> vector<32x128xf32>
    %c0_17 = arith.constant 0 : index
    %c0_18 = arith.constant 0 : index
    %42 = vector.load %arg6[%c0_17, %c0_18] : memref<1x128xf32, #tpu.memory_space<vmem>>, vector<1x128xf32>
    %43 = vector.broadcast %42 : vector<1x128xf32> to vector<32x128xf32>
    %44 = arith.addf %41, %43 : vector<32x128xf32>
    %45 = arith.addf %0, %44 : vector<32x128xf32>
    %46 = arith.mulf %45, %45 : vector<32x128xf32>
    %cst_19 = arith.constant dense<0.000000e+00> : vector<32xf32>
    %47 = vector.multi_reduction <add>, %46, %cst_19 [1] : vector<32x128xf32> to vector<32xf32>
    %48 = vector.shape_cast %47 : vector<32xf32> to vector<32x1xf32>
    %cst_20 = arith.constant 1.280000e+02 : f32
    %49 = vector.broadcast %cst_20 : f32 to vector<32x1xf32>
    %50 = arith.divf %48, %49 : vector<32x1xf32>
    %cst_21 = arith.constant 9.99999997E-7 : f32
    %51 = vector.broadcast %cst_21 : f32 to vector<32x1xf32>
    %52 = arith.addf %50, %51 : vector<32x1xf32>
    %53 = math.rsqrt %52 : vector<32x1xf32>
    %54 = vector.broadcast %53 : vector<32x1xf32> to vector<32x128xf32>
    %55 = arith.mulf %45, %54 : vector<32x128xf32>
    %c0_22 = arith.constant 0 : index
    %c0_23 = arith.constant 0 : index
    %56 = vector.load %arg7[%c0_22, %c0_23] : memref<1x128xf32, #tpu.memory_space<vmem>>, vector<1x128xf32>
    %57 = vector.broadcast %56 : vector<1x128xf32> to vector<32x128xf32>
    %58 = arith.mulf %55, %57 : vector<32x128xf32>
    %59 = arith.truncf %58 : vector<32x128xf32> to vector<32x128xbf16>
    %c0_24 = arith.constant 0 : index
    %c0_25 = arith.constant 0 : index
    %60 = vector.load %arg8[%c0_24, %c0_25] : memref<128x512xbf16, #tpu.memory_space<vmem>>, vector<128x512xbf16>
    %cst_26 = arith.constant dense<0.000000e+00> : vector<32x512xf32>
    %61 = tpu.matmul %59, %60, %cst_26 {dimension_numbers = #tpu.dot_dimension_numbers<[1], [0], [0], [1], [0, 0, 1, 1], [], []>} : vector<32x128xbf16>, vector<128x512xbf16>, vector<32x512xf32> -> vector<32x512xf32>
    %c0_27 = arith.constant 0 : index
    %c0_28 = arith.constant 0 : index
    %62 = vector.load %arg9[%c0_27, %c0_28] : memref<1x512xf32, #tpu.memory_space<vmem>>, vector<1x512xf32>
    %63 = vector.broadcast %62 : vector<1x512xf32> to vector<32x512xf32>
    %64 = arith.addf %61, %63 : vector<32x512xf32>
    %65 = arith.truncf %64 : vector<32x512xf32> to vector<32x512xbf16>
    %cst_29 = arith.constant 5.000000e-01 : bf16
    %66 = vector.broadcast %cst_29 : bf16 to vector<32x512xbf16>
    %67 = arith.mulf %66, %65 : vector<32x512xbf16>
    %cst_30 = arith.constant 7.070310e-01 : bf16
    %68 = vector.broadcast %cst_30 : bf16 to vector<32x512xbf16>
    %69 = arith.mulf %65, %68 : vector<32x512xbf16>
    %70 = math.absf %69 : vector<32x512xbf16>
    %cst_31 = arith.constant 3.281250e-01 : bf16
    %71 = vector.broadcast %cst_31 : bf16 to vector<32x512xbf16>
    %72 = arith.mulf %71, %70 : vector<32x512xbf16>
    %cst_32 = arith.constant 1.000000e+00 : bf16
    %73 = vector.broadcast %cst_32 : bf16 to vector<32x512xbf16>
    %74 = arith.addf %73, %72 : vector<32x512xbf16>
    %cst_33 = arith.constant 1.000000e+00 : bf16
    %75 = vector.broadcast %cst_33 : bf16 to vector<32x512xbf16>
    %76 = arith.divf %75, %74 : vector<32x512xbf16>
    %cst_34 = arith.constant 1.062500e+00 : bf16
    %77 = vector.broadcast %cst_34 : bf16 to vector<32x512xbf16>
    %78 = arith.mulf %77, %76 : vector<32x512xbf16>
    %cst_35 = arith.constant -1.453130e+00 : bf16
    %79 = vector.broadcast %cst_35 : bf16 to vector<32x512xbf16>
    %80 = arith.addf %78, %79 : vector<32x512xbf16>
    %81 = arith.mulf %80, %76 : vector<32x512xbf16>
    %cst_36 = arith.constant 1.421880e+00 : bf16
    %82 = vector.broadcast %cst_36 : bf16 to vector<32x512xbf16>
    %83 = arith.addf %81, %82 : vector<32x512xbf16>
    %84 = arith.mulf %83, %76 : vector<32x512xbf16>
    %cst_37 = arith.constant -2.851560e-01 : bf16
    %85 = vector.broadcast %cst_37 : bf16 to vector<32x512xbf16>
    %86 = arith.addf %84, %85 : vector<32x512xbf16>
    %87 = arith.mulf %86, %76 : vector<32x512xbf16>
    %cst_38 = arith.constant 2.539060e-01 : bf16
    %88 = vector.broadcast %cst_38 : bf16 to vector<32x512xbf16>
    %89 = arith.addf %87, %88 : vector<32x512xbf16>
    %90 = arith.mulf %89, %76 : vector<32x512xbf16>
    %cst_39 = arith.constant 0.000000e+00 : bf16
    %91 = vector.broadcast %cst_39 : bf16 to vector<32x512xbf16>
    %92 = arith.subf %91, %70 : vector<32x512xbf16>
    %93 = arith.mulf %92, %70 : vector<32x512xbf16>
    %94 = math.exp %93 : vector<32x512xbf16>
    %95 = arith.mulf %90, %94 : vector<32x512xbf16>
    %cst_40 = arith.constant 1.000000e+00 : bf16
    %96 = vector.broadcast %cst_40 : bf16 to vector<32x512xbf16>
    %97 = arith.subf %96, %95 : vector<32x512xbf16>
    %cst_41 = arith.constant 0.000000e+00 : bf16
    %98 = vector.broadcast %cst_41 : bf16 to vector<32x512xbf16>
    %99 = arith.cmpf olt, %69, %98 : vector<32x512xbf16>
    %cst_42 = arith.constant 0.000000e+00 : bf16
    %100 = vector.broadcast %cst_42 : bf16 to vector<32x512xbf16>
    %101 = arith.subf %100, %97 : vector<32x512xbf16>
    %102 = arith.select %99, %101, %97 : vector<32x512xi1>, vector<32x512xbf16>
    %cst_43 = arith.constant 1.000000e+00 : bf16
    %103 = vector.broadcast %cst_43 : bf16 to vector<32x512xbf16>
    %104 = arith.addf %103, %102 : vector<32x512xbf16>
    %105 = arith.mulf %67, %104 : vector<32x512xbf16>
    %c0_44 = arith.constant 0 : index
    %c0_45 = arith.constant 0 : index
    %106 = vector.load %arg10[%c0_44, %c0_45] : memref<512x128xbf16, #tpu.memory_space<vmem>>, vector<512x128xbf16>
    %cst_46 = arith.constant dense<0.000000e+00> : vector<32x128xf32>
    %107 = tpu.matmul %105, %106, %cst_46 {dimension_numbers = #tpu.dot_dimension_numbers<[1], [0], [0], [1], [0, 0, 1, 1], [], []>} : vector<32x512xbf16>, vector<512x128xbf16>, vector<32x128xf32> -> vector<32x128xf32>
    %c0_47 = arith.constant 0 : index
    %c0_48 = arith.constant 0 : index
    %108 = vector.load %arg11[%c0_47, %c0_48] : memref<1x128xf32, #tpu.memory_space<vmem>>, vector<1x128xf32>
    %109 = vector.broadcast %108 : vector<1x128xf32> to vector<32x128xf32>
    %110 = arith.addf %107, %109 : vector<32x128xf32>
    %111 = arith.addf %45, %110 : vector<32x128xf32>
    %c0_49 = arith.constant 0 : index
    %c0_50 = arith.constant 0 : index
    %112 = vector.load %arg12[%c0_49, %c0_50] : memref<32x128xf32, #tpu.memory_space<vmem>>, vector<32x128xf32>
    tpu.vector_store %arg12[%c0_49, %c0_50], %111 {strides = array<i32>} : memref<32x128xf32, #tpu.memory_space<vmem>>, vector<32x128xf32>,
    return
  }
  func.func @transform_0(%arg0: i32) -> (i32, i32) {
    %c0_i32 = arith.constant 0 : i32
    %c0_i32_0 = arith.constant 0 : i32
    return %arg0, %c0_i32 : i32, i32
  }
  func.func @transform_1(%arg0: i32) -> (i32, i32) {
    %c0_i32 = arith.constant 0 : i32
    %c0_i32_0 = arith.constant 0 : i32
    %c0_i32_1 = arith.constant 0 : i32
    return %c0_i32, %c0_i32_0 : i32, i32
  }
  func.func @transform_2(%arg0: i32) -> (i32, i32) {
    %c0_i32 = arith.constant 0 : i32
    %c0_i32_0 = arith.constant 0 : i32
    %c0_i32_1 = arith.constant 0 : i32
    return %c0_i32, %c0_i32_0 : i32, i32
  }
  func.func @transform_3(%arg0: i32) -> (i32, i32) {
    %c0_i32 = arith.constant 0 : i32
    %c0_i32_0 = arith.constant 0 : i32
    %c0_i32_1 = arith.constant 0 : i32
    return %c0_i32, %c0_i32_0 : i32, i32
  }
  func.func @transform_4(%arg0: i32) -> (i32, i32) {
    %c0_i32 = arith.constant 0 : i32
    %c0_i32_0 = arith.constant 0 : i32
    %c0_i32_1 = arith.constant 0 : i32
    return %c0_i32, %c0_i32_0 : i32, i32
  }
  func.func @transform_5(%arg0: i32) -> (i32, i32) {
    %c0_i32 = arith.constant 0 : i32
    %c0_i32_0 = arith.constant 0 : i32
    %c0_i32_1 = arith.constant 0 : i32
    return %c0_i32, %c0_i32_0 : i32, i32
  }
  func.func @transform_6(%arg0: i32) -> (i32, i32) {
    %c0_i32 = arith.constant 0 : i32
    %c0_i32_0 = arith.constant 0 : i32
    %c0_i32_1 = arith.constant 0 : i32
    return %c0_i32, %c0_i32_0 : i32, i32
  }
  func.func @transform_7(%arg0: i32) -> (i32, i32) {
    %c0_i32 = arith.constant 0 : i32
    %c0_i32_0 = arith.constant 0 : i32
    %c0_i32_1 = arith.constant 0 : i32
    return %c0_i32, %c0_i32_0 : i32, i32
  }
  func.func @transform_8(%arg0: i32) -> (i32, i32) {
    %c0_i32 = arith.constant 0 : i32
    %c0_i32_0 = arith.constant 0 : i32
    %c0_i32_1 = arith.constant 0 : i32
    return %c0_i32, %c0_i32_0 : i32, i32
  }
  func.func @transform_9(%arg0: i32) -> (i32, i32) {
    %c0_i32 = arith.constant 0 : i32
    %c0_i32_0 = arith.constant 0 : i32
    %c0_i32_1 = arith.constant 0 : i32
    return %c0_i32, %c0_i32_0 : i32, i32
  }
  func.func @transform_10(%arg0: i32) -> (i32, i32) {
    %c0_i32 = arith.constant 0 : i32
    %c0_i32_0 = arith.constant 0 : i32
    %c0_i32_1 = arith.constant 0 : i32
    return %c0_i32, %c0_i32_0 : i32, i32
  }
  func.func @transform_11(%arg0: i32) -> (i32, i32) {
    %c0_i32 = arith.constant 0 : i32
    %c0_i32_0 = arith.constant 0 : i32
    return %arg0, %c0_i32 : i32, i32
  }
}

</mosaic_0001>

<bundles_post_ra>
// kernel: tpu_custom_call.1
= control target key start
LH: loop header
LB: loop body
LE: loop exit
PB: predicated region body
PF: predicated region fallthrough
CT: control target
= control target key end

     0   :  { %s3655_s0 = inlined_call_operand.hbm [shape: f32[64,128], index: 0, kind: input, shape index: {}]   ;;  %s3656_s1 = inlined_call_operand.hbm [shape: f32[1,128], index: 1, kind: input, shape index: {}]   ;;  %s3657_s2 = inlined_call_operand.hbm [shape: bf16[128,384], index: 2, kind: input, shape index: {}]   ;;  %s3658_s3 = inlined_call_operand.vmem [shape: f32[1,384], index: 3, kind: input, shape index: {}]   ;;  %s3659_s4 = inlined_call_operand.hbm [shape: bf16[128,128], index: 4, kind: input, shape index: {}]   ;;  %s3660_s5 = inlined_call_operand.vmem [shape: f32[1,128], index: 5, kind: input, shape index: {}]   ;;  %s3661_s6 = inlined_call_operand.vmem [shape: f32[1,128], index: 6, kind: input, shape index: {}]   ;;  %s3662_s7 = inlined_call_operand.hbm [shape: bf16[128,512], index: 7, kind: input, shape index: {}]   ;;  %s3663_s8 = inlined_call_operand.vmem [shape: f32[1,512], index: 8, kind: input, shape index: {}]   ;;  %s3664_s9 = inlined_call_operand.hbm [shape: bf16[512,128], index: 9, kind: input, shape index: {}]   ;;  %s3665_s10 = inlined_call_operand.vmem [shape: f32[1,128], index: 10, kind: input, shape index: {}]   ;;  %s3666_s11 = inlined_call_operand.hbm [shape: f32[64,128], index: 11, kind: output, shape index: {}]  }
   0x1   :  { %3673 = sst [smem:[#allocation19_spill]] %s3656_s1 }
   0x2   :  { %3674 = sst [smem:[#allocation20_spill]] %s3659_s4 }
   0x3   :  { %3675 = sst [smem:[#allocation21_spill]] %s3666_s11 }
   0x4   :  { %16 = vsyncpa [#allocation3], 0 }
   0x5   :  { %18 = vsyncpa [#allocation3 + $0x1], 0 }
   0x6   :  { %19 = vsyncpa [#allocation6], 0 }
   0x7   :  { %20 = vsyncpa [#allocation9], 0 }
   0x8   :  { %21 = vsyncpa [#allocation12], 0 }
   0x9   :  { %22 = vsyncpa [#allocation4], 0 }
   0xa   :  { %24 = vsyncpa [#allocation4 + $0x1], 0  ;;  %s3081_s17 = smov 0   ;;  %s3083_s18 = smov 0  }
   0xb   :  { %s3085_s19 = smov 0   ;;  %s3087_s20 = smov 0  }
   0xc LB: > { %s3003_s21 = smov [#allocation5]   ;;  %s3102_s23 = sadd.s32 4294967295, %s3001_s20   ;;  %s3001_s20 = sphi %s3087_s20, %s3710_s20   ;;  %s2997_s19 = sphi %s3085_s19, %s3709_s19   ;;  %s2993_s18 = sphi %s3083_s18, %s3708_s18   ;;  %s2989_s17 = sphi %s3081_s17, %s3707_s17  }
   0xd   : > { %s310_s22 = sshll.u32 %s3003_s21, 4  ;;  %p2194_p0 = scmp.ge.s32.totalorder %s3001_s20, 1  ;;  %s3107_s22 = int_to_ptr.vmem [resolvable:$true] %s310_s22 }
   0xe   : > { %p3670_p1 = scmp.eq.s32.totalorder %s3102_s23, 0  ;;  %p297_p2 = scmp.lt.s32.totalorder %s3001_s20, 3 }
   0xf   : > { %s3004_s25 = smov [#allocation8]   ;;  %s3005_s28 = smov [#allocation7]  }
  0x10   : > { %p3109_p3 = pnand %p2194_p0, %p297_p2  ;;  %s336_s26 = sshll.u32 %s3004_s25, 4  ;;  %s3116_s26 = int_to_ptr.vmem [resolvable:$true] %s336_s26 }
  0x11   : > { %s320_s29 = sshll.u32 %s3005_s28, 4  ;;  %s3678_s1 = sld [smem:[#allocation19_spill]]  ;;  %s3124_s29 = int_to_ptr.vmem [resolvable:$true] %s320_s29 }
  0x12   : > { %s3676_s24 = scalar_select %p3109_p3, 1, 0 }
  0x13   : > { %p2485_p5 = pneg %p3109_p3 }
  0x15   : > { %p3120_p6 = pnand %p2485_p5, %p3670_p1 }
  0x17   : > { %s2753_s13 = scalar_lea.hbm %s3678_s1, 16  ;;  %p3134_p8 = pneg %p3120_p6 }
  0x18   : > { %p2754_p7 = scmp.ne.s32.totalorder %s3678_s1, %s2753_s13  ;;  %p2760_p11 = scmp.lt.u32.totalorder %s2753_s13, %s3678_s1 }
  0x1a   : > { %p2756_p9 = pnand %p3134_p8, %p2754_p7 }
  0x1c   : > { %p2757_p10 = pneg %p2756_p9 }
  0x1e   : > { %p2762_p12 = pnand %p2760_p11, %p2757_p10 }
  0x20   : > { %2765 = shalt.err (!%p2762_p12)
}
  0x21   : > { %s2766_s28 = scalar_lea.vmem %s3107_s22, 16  ;;  %s2773_s30 = scalar_lea.vmem %s3107_s22, 32 }
  0x22   : > { %p2767_p13 = scmp.ne.s32.totalorder %s3107_s22, %s2766_s28  ;;  %p2774_p5 = scmp.lt.s32.totalorder %s3107_s22, %s3107_s22 }
  0x23   : > { %p2775_p7 = scmp.lt.s32.totalorder %s2773_s30, %s2766_s28 }
  0x24   : > { %p2769_p0 = pnand %p2767_p13, %p3134_p8 }
  0x25   : > { %p2776_p9 = por %p2775_p7, %p2774_p5 }
  0x26   : > { %p2770_p2 = pneg %p2769_p0 }
  0x28   : > { %p2777_p4 = pnand %p2776_p9, %p2770_p2 }
  0x2a   : > { %2780 = shalt.err (!%p2777_p4)
}
  0x2b   : > { %2488 = dma.hbm_to_vmem [thread:$0]  (!%p3120_p6), %s3678_s1, 16, %s3107_s22, [#allocation6]  }
  0x2c   : > { %s3680_s4 = sld [smem:[#allocation20_spill]] }
  0x32   : > { %s2781_s21 = scalar_lea.hbm %s3680_s4, 1024 }
  0x33   : > { %p2782_p10 = scmp.ne.s32.totalorder %s3680_s4, %s2781_s21  ;;  %p2788_p4 = scmp.lt.u32.totalorder %s2781_s21, %s3680_s4 }
  0x35   : > { %p2784_p11 = pnand %p2782_p10, %p3134_p8 }
  0x37   : > { %p2785_p12 = pneg %p2784_p11 }
  0x39   : > { %p2790_p13 = pnand %p2788_p4, %p2785_p12 }
  0x3b   : > { %2793 = shalt.err (!%p2790_p13)
}
  0x3c   : > { %s2794_s22 = scalar_lea.vmem %s3116_s26, 1024  ;;  %p2802_p7 = scmp.lt.s32.totalorder %s3116_s26, %s3116_s26 }
  0x3d   : > { %p2795_p0 = scmp.ne.s32.totalorder %s3116_s26, %s2794_s22  ;;  %p2803_p9 = scmp.lt.s32.totalorder %s2794_s22, %s2794_s22 }
  0x3f   : > { %p2797_p2 = pnand %p2795_p0, %p3134_p8  ;;  %p2804_p10 = por %p2803_p9, %p2802_p7 }
  0x41   : > { %p2798_p5 = pneg %p2797_p2 }
  0x43   : > { %p2805_p11 = pnand %p2804_p10, %p2798_p5 }
  0x45   : > { %2808 = shalt.err (!%p2805_p11)
}
  0x46   : > { %s3668_s11 = smov 64   ;;  %s3669_s12 = smov 4  }
  0x47   : > { %2494 = dma.hbm_to_vmem [thread:$0]  (!%p3120_p6), %s3680_s4, 1024, %s3116_s26, [#allocation9], %s3668_s11, %s3668_s11, %s3669_s12  }
  0x48   : > { %s2809_s25 = scalar_lea.hbm %s3657_s2, 3072 }
  0x49   : > { %p2810_p12 = scmp.ne.s32.totalorder %s3657_s2, %s2809_s25  ;;  %p2816_p0 = scmp.lt.u32.totalorder %s2809_s25, %s3657_s2 }
  0x4b   : > { %p2812_p4 = pnand %p2810_p12, %p3134_p8 }
  0x4d   : > { %p2813_p13 = pneg %p2812_p4 }
  0x4f   : > { %p2818_p2 = pnand %p2816_p0, %p2813_p13 }
  0x51   : > { %2821 = shalt.err (!%p2818_p2)
}
  0x52   : > { %s2822_s26 = scalar_lea.vmem %s3124_s29, 3072  ;;  %p2830_p10 = scmp.lt.s32.totalorder %s3124_s29, %s3124_s29 }
  0x53   : > { %p2823_p5 = scmp.ne.s32.totalorder %s3124_s29, %s2822_s26  ;;  %p2831_p11 = scmp.lt.s32.totalorder %s2822_s26, %s2822_s26 }
  0x55   : > { %p2825_p7 = pnand %p2823_p5, %p3134_p8  ;;  %p2832_p12 = por %p2831_p11, %p2830_p10 }
  0x57   : > { %p2826_p9 = pneg %p2825_p7 }
  0x59   : > { %p2833_p4 = pnand %p2832_p12, %p2826_p9 }
  0x5b   : > { %2836 = shalt.err (!%p2833_p4)
}
  0x5c   : > { %s3008_s13 = smov 192   ;;  %s3009_s1 = smov 12  }
  0x5d   : > { %2491 = dma.hbm_to_vmem [thread:$0]  (!%p3120_p6), %s3657_s2, 3072, %s3124_s29, [#allocation6], %s3008_s13, %s3008_s13, %s3009_s1  }
  0x5e   : > { %s3010_s21 = smov [#allocation10]   ;;  %s2837_s22 = scalar_lea.hbm %s3662_s7, 4096 }
  0x5f   : > { %s355_s25 = sshll.u32 %s3010_s21, 4  ;;  %p2838_p13 = scmp.ne.s32.totalorder %s3662_s7, %s2837_s22  ;;  %s356_s25 = int_to_ptr.vmem [resolvable:$true] %s355_s25 }
  0x60   : > { %p2844_p5 = scmp.lt.u32.totalorder %s2837_s22, %s3662_s7 }
  0x61   : > { %p2840_p0 = pnand %p2838_p13, %p3134_p8 }
  0x63   : > { %p2841_p2 = pneg %p2840_p0 }
  0x65   : > { %p2846_p7 = pnand %p2844_p5, %p2841_p2 }
  0x67   : > { %2849 = shalt.err (!%p2846_p7)
}
  0x68   : > { %s2850_s29 = scalar_lea.vmem %s356_s25, 4096  ;;  %p2858_p12 = scmp.lt.s32.totalorder %s356_s25, %s356_s25 }
  0x69   : > { %p2851_p9 = scmp.ne.s32.totalorder %s356_s25, %s2850_s29  ;;  %p2859_p4 = scmp.lt.s32.totalorder %s2850_s29, %s2850_s29 }
  0x6b   : > { %p2853_p10 = pnand %p2851_p9, %p3134_p8  ;;  %p2860_p1 = por %p2859_p4, %p2858_p12 }
  0x6d   : > { %p2854_p11 = pneg %p2853_p10 }
  0x6f   : > { %p2861_p3 = pnand %p2860_p1, %p2854_p11 }
  0x71   : > { %2864 = shalt.err (!%p2861_p3)
}
  0x72   : > { %s3011_s11 = smov 256   ;;  %s3012_s13 = smov 16  }
  0x73   : > { %2497 = dma.hbm_to_vmem [thread:$0]  (!%p3120_p6), %s3662_s7, 4096, %s356_s25, [#allocation9], %s3011_s11, %s3011_s11, %s3012_s13  }
  0x74   : > { %s3013_s1 = smov [#allocation11]   ;;  %s2865_s28 = scalar_lea.hbm %s3664_s9, 4096 }
  0x75   : > { %s371_s14 = sshll.u32 %s3013_s1, 4  ;;  %p2866_p1 = scmp.ne.s32.totalorder %s3664_s9, %s2865_s28  ;;  %s372_s14 = int_to_ptr.vmem [resolvable:$true] %s371_s14 }
  0x76   : > { %p2872_p0 = scmp.lt.u32.totalorder %s2865_s28, %s3664_s9 }
  0x77   : > { %p2868_p3 = pnand %p2866_p1, %p3134_p8 }
  0x79   : > { %p2869_p13 = pneg %p2868_p3 }
  0x7b   : > { %p2874_p2 = pnand %p2872_p0, %p2869_p13 }
  0x7d   : > { %2877 = shalt.err (!%p2874_p2)
}
  0x7e   : > { %s2878_s25 = scalar_lea.vmem %s372_s14, 4096  ;;  %p2886_p10 = scmp.lt.s32.totalorder %s372_s14, %s372_s14 }
  0x7f   : > { %p2879_p5 = scmp.ne.s32.totalorder %s372_s14, %s2878_s25  ;;  %p2887_p11 = scmp.lt.s32.totalorder %s2878_s25, %s2878_s25 }
  0x81   : > { %p2881_p7 = pnand %p2879_p5, %p3134_p8  ;;  %p2888_p12 = por %p2887_p11, %p2886_p10 }
  0x83   : > { %p2882_p9 = pneg %p2881_p7 }
  0x85   : > { %p2889_p4 = pnand %p2888_p12, %p2882_p9 }
  0x87   : > { %2892 = shalt.err (!%p2889_p4)
}
  0x88   : > { %s3681_s11 = smov 4   ;;  %s3682_s13 = smov 64  }
  0x89   : > { %2500 = dma.hbm_to_vmem [thread:$0]  (!%p3120_p6), %s3664_s9, 4096, %s372_s14, [#allocation12], %s3682_s13, %s3682_s13, %s3681_s11  }
  0x8a   : > { %s2193_s27 = sadd.s32 4294967294, %s3001_s20   ;;  %s3246_s16 = sadd.s32 1, %s3001_s20  }
  0x8b   : > { %s37_s1 = sadd.s32 1, %s2997_s19  ;;  %s34_s15 = ssub.s32 %s3001_s20, %s3246_s16 }
  0x8c   : > { %p44_p8 = scmp.ne.s32.totalorder %s2997_s19, %s2993_s18  ;;  %p35_p1 = scmp.eq.s32.totalorder %s34_s15, 0 }
  0x8d   : > { %p45_p3 = scmp.eq.s32.totalorder %s3001_s20, 0  ;;  %p50_p13 = scmp.ne.s32.totalorder %s2993_s18, %s2989_s17 }
  0x8e   : > { %p284_p0 = scmp.eq.s32.totalorder %s3102_s23, 1  ;;  %p3683_p5 = scmp.eq.s32.totalorder %s3102_s23, 0 }
  0x8f   : > { %s3258_s21 = scalar_select %p35_p1, %s2997_s19, %s37_s1  }
  0x90   : > { %p46_p2 = por %p45_p3, %p44_p8  ;;  %p3262_p7 = por %p3683_p5, %p50_p13 }
  0x91   : > { %p3266_p6 = por %p284_p0, %p44_p8  ;;  %p290_p9 = scmp.eq.s32.totalorder %s2193_s27, 1 }
  0x92   : > { %p2514_p10 = scmp.lt.s32.totalorder %s3001_s20, 2  ;;  %s388_s30 = sand.u32 1, %s2997_s19  }
  0x93   : > { %s3685_s14 = scalar_select %p3266_p6, 1, 0 }
  0x94   : > { %p3272_p11 = por %p290_p9, %p50_p13  ;;  %s2201_s26 = sshll.u32 %s388_s30, 5 }
  0x95   : > { %s2319_s29 = sshll.u32 %s3001_s20, 9  ;;  %s392_s4 = scalar_lea.vmem [#allocation2], %s2201_s26 }
  0x96   : > { %s3686_s22 = scalar_select %p3272_p11, 1, 0 }
  0x97   : > { %s3280_s13 = scalar_lea.hbm %s3655_s0, %s2319_s29  ;;  %s399_s12 = sshll.u32 %s392_s4, 4  ;;  %s3286_s12 = int_to_ptr.vmem [resolvable:$true] %s399_s12 }
  0x98   : > { %p3282_p12 = pnand %p2514_p10, %p46_p2  ;;  %s3288_s1 = scalar_lea.sflag [#allocation3], %s388_s30 }
  0x99   : > { %s2893_s15 = scalar_lea.hbm %s3280_s13, 512  ;;  %s2898_s25 = scalar_lea.hbm %s3655_s0, 1024 }
  0x9a   : > { %p2894_p4 = scmp.ne.s32.totalorder %s3280_s13, %s2893_s15  ;;  %p2895_p8 = pneg %p3282_p12 }
  0x9b   : > { %p2899_p13 = scmp.lt.u32.totalorder %s3280_s13, %s3655_s0  ;;  %p2900_p0 = scmp.lt.u32.totalorder %s2898_s25, %s2893_s15 }
  0x9c   : > { %p2896_p1 = pnand %p2895_p8, %p2894_p4  ;;  %p2902_p5 = scmp.lt.u32.totalorder %s2893_s15, %s3280_s13 }
  0x9d   : > { %p2901_p2 = por %p2900_p0, %p2899_p13 }
  0x9e   : > { %p2897_p3 = pneg %p2896_p1 }
  0x9f   : > { %p2903_p9 = por %p2902_p5, %p2901_p2 }
  0xa1   : > { %p2904_p10 = pnand %p2903_p9, %p2897_p3 }
  0xa3   : > { %2907 = shalt.err (!%p2904_p10)
}
  0xa4   : > { %s2908_s30 = scalar_lea.vmem %s3286_s12, 512  ;;  %s3014_s26 = smov [#allocation2]  }
  0xa5   : > { %p2909_p4 = scmp.ne.s32.totalorder %s3286_s12, %s2908_s30  ;;  %s2913_s29 = sshll.u32 %s3014_s26, 4  ;;  %s2914_s29 = int_to_ptr.vmem [resolvable:$false] %s2913_s29 }
  0xa6   : > { %s2915_s11 = scalar_lea.vmem %s2914_s29, 1024  ;;  %p2916_p6 = scmp.lt.s32.totalorder %s3286_s12, %s2914_s29 }
  0xa7   : > { %p2911_p1 = pnand %p2909_p4, %p2895_p8  ;;  %p2917_p13 = scmp.lt.s32.totalorder %s2915_s11, %s2908_s30 }
  0xa9   : > { %p2912_p11 = pneg %p2911_p1  ;;  %p2918_p0 = por %p2917_p13, %p2916_p6 }
  0xab   : > { %p2919_p2 = pnand %p2918_p0, %p2912_p11 }
  0xad   : > { %2922 = shalt.err (!%p2919_p2)
}
  0xae   : > { %s3015_s15 = smov 128   ;;  %s3016_s25 = smov 8  }
  0xaf   : > { %2504 = dma.hbm_to_vmem [thread:$0]  (!%p3282_p12), %s3280_s13, 512, %s3286_s12, %s3288_s1, %s3015_s15, %s3015_s15, %s3016_s25  }
  0xb0   : > { %p3688_p8 = scmp.ne.s32.totalorder %s3676_s24, 0 }
  0xb1   : > { %s3319_s4 = sand.u32 (!%p3688_p8), 1, %s2993_s18  }
  0xb2   : > { %411 = sbr.rel (%p3688_p8) target bundleno = 2262 (0x8d6), region = 64  ;;  %s2205_s30 = sshll.u32 (!%p3688_p8), %s3319_s4, 5 }
  0xb3   : > { %s414_s26 = scalar_lea.sflag (!%p3688_p8), [#allocation3], %s3319_s4  ;;  %s417_s29 = scalar_lea.vmem (!%p3688_p8), [#allocation2], %s2205_s30 }
  0xb9   : > { %2968 = dma.done.wait (%p3262_p7), %s414_s26, 512  }
  0xba   : > { %2970 = vsyncadd (%p3262_p7), %s414_s26, 4294966784  ;;  %p3689_p6 = scmp.eq.s32.totalorder %s3102_s23, 0 }
  0xbc   : > { %2972 = dma.done.wait (%p3689_p6), [#allocation6], 3088   ;;  %p3690_p11 = pmov %p3689_p6 }
  0xbd   : > { %p3691_p12 = pmov %p3689_p6 }
  0xbe   : > { %2974 = vsyncadd (%p3690_p11), [#allocation6], 4294964208 }
  0xbf   : > { %2976 = dma.done.wait (%p3691_p12), [#allocation9], 5120   ;;  %p3692_p3 = pmov %p3689_p6 }
  0xc1   : > { %2978 = vsyncadd (%p3692_p3), [#allocation9], 4294962176  ;;  %p3693_p5 = pmov %p3692_p3 }
  0xc2   : > { %p3694_p9 = pmov %p3692_p3 }
  0xc3   : > { %2980 = dma.done.wait (%p3693_p5), [#allocation12], 4096  }
  0xc4   : > { %2982 = vsyncadd (%p3694_p9), [#allocation12], 4294963200  ;;  %v3341_v0 = vld [vmem:[%s417_s29] sm:$0xff]  ;;  %v3343_v1 = vld [vmem:[%s417_s29 + $0x10] sm:$0xff]  ;;  %v3017_v30 = vmov 0   ;;  %v568_v60 = vlaneseq  ;;  %vm868_vm0 = vcmask 261120  }
  0xc5   : > { %v3345_v2 = vld [vmem:[%s417_s29 + $0x8] sm:$0xff]  ;;  %v492_v3 = vmul.f32 %v3341_v0, %v3341_v0  ;;  %v494_v4 = vmul.f32 %v3343_v1, %v3343_v1  ;;  %v3351_v5 = vld [vmem:[%s417_s29 + $0x18] sm:$0xff]  ;;  %743 = vmatprep.mubr.bf16.mxu0 %v3017_v30  ;;  %v2212_v50 = vld [vmem:[#allocation5] ss:$0 sm:$0xff]  ;;  %s475_s29 = scalar_lea.vmem [#allocation13], %s2205_s30  ;;  %s2320_s24 = sshll.u32 %s3102_s23, 9 }
  0xc6   : > { %v2569_v6 = vld [vmem:[#allocation7 + $0x4] ss:$12 sps:$4 sm:$0xff]   ;;  %v2571_v7 = vld [vmem:[#allocation7] ss:$12 sps:$4 sm:$0xff]   ;;  %v493_v8 = vmul.f32 %v3345_v2, %v3345_v2  ;;  %v495_v9 = vmul.f32 %v3351_v5, %v3351_v5  ;;  %v2572_v10 = vld [vmem:[#allocation7 + $0x8] ss:$12 sps:$4 sm:$0xff]  }
  0xc7   : > { %496 = vadd.xlane.f32.xlu0 %v492_v3  ;;  %500 = vadd.xlane.f32.xlu1 %v494_v4  ;;  %v2573_v11 = vld [vmem:[#allocation7 + $0x1c] ss:$12 sps:$4 sm:$0xff]   ;;  %v2575_v12 = vld [vmem:[#allocation7 + $0x18] ss:$12 sps:$4 sm:$0xff]   ;;  %v2576_v13 = vld [vmem:[#allocation7 + $0x20] ss:$12 sps:$4 sm:$0xff]  }
  0xc8   : > { %711 = vmatprep.subr.bf16.mxu0 %v2569_v6  ;;  %2405 = vmatprep.subr.bf16.mxu1 %v2572_v10  ;;  %v2577_v14 = vld [vmem:[#allocation7 + $0x34] ss:$12 sps:$4 sm:$0xff]   ;;  %v2579_v15 = vld [vmem:[#allocation7 + $0x30] ss:$12 sps:$4 sm:$0xff]   ;;  %v2580_v16 = vld [vmem:[#allocation7 + $0x38] ss:$12 sps:$4 sm:$0xff]  }
  0xc9   : > { %712 = vmatpush1.bf16.msra.mxu0 %v2571_v7  ;;  %2406 = vmatpush3.bf16.msra.mxu1 %v2572_v10  ;;  %v2581_v17 = vld [vmem:[#allocation7 + $0x4c] ss:$12 sps:$4 sm:$0xff]   ;;  %v2583_v18 = vld [vmem:[#allocation7 + $0x48] ss:$12 sps:$4 sm:$0xff]   ;;  %v2584_v19 = vld [vmem:[#allocation7 + $0x50] ss:$12 sps:$4 sm:$0xff]  }
  0xca   : > { %713 = vmatprep.subr.bf16.mxu0 %v2573_v11  ;;  %2407 = vmatprep.subr.bf16.mxu1 %v2576_v13  ;;  %v2585_v20 = vld [vmem:[#allocation7 + $0x64] ss:$12 sps:$4 sm:$0xff]   ;;  %v2587_v21 = vld [vmem:[#allocation7 + $0x60] ss:$12 sps:$4 sm:$0xff]   ;;  %v2588_v22 = vld [vmem:[#allocation7 + $0x68] ss:$12 sps:$4 sm:$0xff]  }
  0xcb   : > { %498 = vadd.xlane.f32.xlu0 %v493_v8  ;;  %502 = vadd.xlane.f32.xlu1 %v495_v9  ;;  %v2589_v23 = vld [vmem:[#allocation7 + $0x7c] ss:$12 sps:$4 sm:$0xff]   ;;  %v2592_v24 = vld [vmem:[#allocation7 + $0x80] ss:$12 sps:$4 sm:$0xff]   ;;  %v2591_v25 = vld [vmem:[#allocation7 + $0x78] ss:$12 sps:$4 sm:$0xff]  }
  0xcc   : > { %v2593_v26 = vld [vmem:[#allocation7 + $0x94] ss:$12 sps:$4 sm:$0xff]   ;;  %v2596_v27 = vld [vmem:[#allocation7 + $0x98] ss:$12 sps:$4 sm:$0xff]   ;;  %v2595_v28 = vld [vmem:[#allocation7 + $0x90] ss:$12 sps:$4 sm:$0xff]  }
  0xcd   : > { %714 = vmatpush1.bf16.msra.mxu0 %v2575_v12  ;;  %2408 = vmatpush3.bf16.msra.mxu1 %v2576_v13  ;;  %v2597_v29 = vld [vmem:[#allocation7 + $0xac] ss:$12 sps:$4 sm:$0xff]   ;;  %v2599_v31 = vld [vmem:[#allocation7 + $0xa8] ss:$12 sps:$4 sm:$0xff]   ;;  %v2600_v32 = vld [vmem:[#allocation7 + $0xb0] ss:$12 sps:$4 sm:$0xff]  }
  0xce   : > { %715 = vmatprep.subr.bf16.mxu0 %v2577_v14  ;;  %2409 = vmatprep.subr.bf16.mxu1 %v2580_v16  ;;  %v3363_v61 = vshrl.u32 %v568_v60, 7  ;;  %v566_v3 = vld [vmem:[%s3658_s3] sm:$0x7]  ;;  %s2072_s30 = sshll.u32 %s475_s29, 4  ;;  %s3703_s12 = sld [smem:[#allocation21_spill]]  ;;  %s3604_s30 = int_to_ptr.vmem [resolvable:$true] %s2072_s30 }
  0xcf   : > { %s2059_s1 = scalar_lea.sflag [#allocation4], %s3319_s4  ;;  %s2923_s11 = scalar_lea.vmem %s3604_s30, 512 }
  0xd0   : > { %v578_v62 = vsub.s32 2, %v3363_v61  ;;  %v570_v63 = vsub.s32 0, %v3363_v61  ;;  %v574_v4 = vsub.s32 1, %v3363_v61  ;;  %p2924_p7 = scmp.ne.s32.totalorder %s3604_s30, %s2923_s11  ;;  %p3704_p10 = scmp.ne.s32.totalorder %s3685_s14, 0 }
  0xd1   : > { %716 = vmatpush1.bf16.msra.mxu0 %v2579_v15  ;;  %2410 = vmatpush3.bf16.msra.mxu1 %v2580_v16  ;;  %s3018_s23 = smov [#allocation13]  }
  0xd2   : > { %717 = vmatprep.subr.bf16.mxu0 %v2581_v17  ;;  %2411 = vmatprep.subr.bf16.mxu1 %v2584_v19  ;;  %v579_v6 = vrot.slane %v566_v3, %v578_v62  ;;  %v571_v7 = vrot.slane %v566_v3, %v570_v63  ;;  %v575_v9 = vrot.slane %v566_v3, %v574_v4  ;;  %p2925_p4 = pnand %p2924_p7, %p3704_p10  ;;  %s2927_s15 = sshll.u32 %s3018_s23, 4  ;;  %s2928_s15 = int_to_ptr.vmem [resolvable:$false] %s2927_s15 }
  0xd3   : > { %s2929_s25 = scalar_lea.vmem %s2928_s15, 1024  ;;  %p2930_p13 = scmp.lt.s32.totalorder %s3604_s30, %s2928_s15 }
  0xd4   : > { %s3610_s27 = scalar_lea.hbm %s3703_s12, %s2320_s24  ;;  %p2926_p1 = pneg %p2925_p4 }
  0xd5   : > { %718 = vmatpush1.bf16.msra.mxu0 %v2583_v18  ;;  %2412 = vmatpush3.bf16.msra.mxu1 %v2584_v19  ;;  %p2931_p0 = scmp.lt.s32.totalorder %s2929_s25, %s2923_s11 }
  0xd6   : > { %719 = vmatprep.subr.bf16.mxu0 %v2585_v20  ;;  %2413 = vmatprep.subr.bf16.mxu1 %v2588_v22 }
  0xd7   : > { %p2932_p2 = por %p2931_p0, %p2930_p13 }
  0xd9   : > { %720 = vmatpush1.bf16.msra.mxu0 %v2587_v21  ;;  %2414 = vmatpush3.bf16.msra.mxu1 %v2588_v22  ;;  %p2933_p8 = pnand %p2932_p2, %p2926_p1 }
  0xda   : > { %721 = vmatprep.subr.bf16.mxu0 %v2589_v23  ;;  %2415 = vmatprep.subr.bf16.mxu1 %v2592_v24 }
  0xdd   : > { %722 = vmatpush1.bf16.msra.mxu0 %v2591_v25  ;;  %2416 = vmatpush3.bf16.msra.mxu1 %v2592_v24 }
  0xde   : > { %723 = vmatprep.subr.bf16.mxu0 %v2593_v26  ;;  %2417 = vmatprep.subr.bf16.mxu1 %v2596_v27 }
  0xe1   : > { %724 = vmatpush1.bf16.msra.mxu0 %v2595_v28  ;;  %2418 = vmatpush3.bf16.msra.mxu1 %v2596_v27 }
  0xe2   : > { %725 = vmatprep.subr.bf16.mxu0 %v2597_v29  ;;  %2419 = vmatprep.subr.bf16.mxu1 %v2600_v32 }
  0xe5   : > { %726 = vmatpush1.bf16.msra.mxu0 %v2599_v31  ;;  %2420 = vmatpush3.bf16.msra.mxu1 %v2600_v32 }
 0x154   : > { %v497_v33 = vpop.xlane.xlu0 %496  ;;  %v501_v34 = vpop.xlane.xlu1 %500 }
 0x155   : > { %v505_v35 = vmul.f32 0.0078125, %v497_v33  ;;  %v507_v36 = vmul.f32 0.0078125, %v501_v34 }
 0x157   : > { %v509_v37 = vadd.f32 1e-06, %v505_v35  ;;  %v511_v38 = vadd.f32 1e-06, %v507_v36 }
 0x158   : > { %v499_v39 = vpop.xlane.xlu0 %498  ;;  %v503_v40 = vpop.xlane.xlu1 %502 }
 0x159   : > { %2689 = vrsqrt.f32 %v509_v37  ;;  %v506_v41 = vmul.f32 0.0078125, %v499_v39  ;;  %v508_v42 = vmul.f32 0.0078125, %v503_v40 }
 0x15a   : > { %2691 = vrsqrt.f32 %v511_v38 }
 0x15b   : > { %v510_v43 = vadd.f32 1e-06, %v506_v41  ;;  %v512_v44 = vadd.f32 1e-06, %v508_v42 }
 0x15d   : > { %2693 = vrsqrt.f32 %v510_v43 }
 0x15e   : > { %2695 = vrsqrt.f32 %v512_v44 }
 0x163   : > { %v2690_v45 = vpop.eup %2689 }
 0x164   : > { %v2692_v46 = vpop.eup %2691  ;;  %v517_v48 = vmul.f32 %v2690_v45, %v3341_v0 }
 0x165   : > { %v519_v47 = vmul.f32 %v2692_v46, %v3343_v1 }
 0x166   : > { %v528_v55 = vmul.f32 %v2212_v50, %v517_v48 }
 0x167   : > { %v2694_v49 = vpop.eup %2693  ;;  %v530_v54 = vmul.f32 %v2212_v50, %v519_v47 }
 0x168   : > { %v2696_v51 = vpop.eup %2695  ;;  %v518_v52 = vmul.f32 %v2694_v49, %v3345_v2 }
 0x169   : > { %v520_v53 = vmul.f32 %v2696_v51, %v3351_v5 }
 0x16a   : > { %v529_v56 = vmul.f32 %v2212_v50, %v518_v52 }
 0x16b   : > { %v531_v57 = vmul.f32 %v2212_v50, %v520_v53 }
 0x16c   : > { %v532_v58 = vpack.c.bf16 %v529_v56, %v528_v55 }
 0x16d   : > { %v533_v59 = vpack.c.bf16 %v531_v57, %v530_v54 }
 0x16e   : > { %744 = vmatmul.mubr.bf16.vlgmr.msra.gmra.mrb[0].mxu0 %v532_v58  ;;  %2421 = vmatprep.mubr.bf16.mxu1 %v532_v58 }
 0x16f   : > { %2422 = vmatmul.mubr.bf16.vlgmr.msra.gmra.mrb[0].mxu1 %v533_v59  ;;  %753 = vmatprep.mubr.bf16.mxu0 %v3017_v30 }
 0x176   : > { %754 = vmatmul.mubr.bf16.gmra.mrb[4].mxu0 %v533_v59 }
 0x241   : > { %v745_v8 = vpop.f32.mrb[0].mxu0 }
 0x242   : > { %v747_v10 = vpop.f32.mrb[1].mxu0  ;;  %v2423_v11 = vpop.f32.mrb[0].mxu1  ;;  %v746_v15 = vadd.f32 %v745_v8, %v571_v7 }
 0x243   : > { %v807_v12 = vadd.f32 %v2423_v11, %v579_v6  ;;  %v749_v13 = vpop.f32.mrb[2].mxu0  ;;  %v798_v14 = vpop.f32.mrb[1].mxu1  ;;  %v748_v20 = vadd.f32 %v747_v10, %v575_v9 }
 0x244   : > { %v750_v16 = vadd.f32 %v749_v13, %v571_v7  ;;  %v799_v17 = vadd.f32 %v798_v14, %v579_v6  ;;  %v751_v18 = vpop.f32.mrb[3].mxu0  ;;  %v2424_v19 = vpop.f32.mrb[2].mxu1  ;;  %v2602_v13 = vld [vmem:[#allocation8 + $0x8] sm:$0xff]   ;;  %v2603_v14 = vld [vmem:[#allocation8 + $0x10] sm:$0xff]  }
 0x245   : > { %v752_v21 = vadd.f32 %v751_v18, %v575_v9  ;;  %v810_v22 = vadd.f32 %v2424_v19, %v579_v6  ;;  %v801_v23 = vpop.f32.mrb[3].mxu1  ;;  %v2607_v18 = vld [vmem:[#allocation8 + $0x30] sm:$0xff]  }
 0x246   : > { %v813_v24 = vpack.c.bf16 %v750_v16, %v746_v15  ;;  %v802_v25 = vadd.f32 %v801_v23, %v579_v6  ;;  %v2604_v15 = vld [vmem:[#allocation8 + $0x18] sm:$0xff]   ;;  %v2605_v16 = vld [vmem:[#allocation8 + $0x20] sm:$0xff]  }
 0x247   : > { %v815_v26 = vpack.c.bf16 %v752_v21, %v748_v20  ;;  %v818_v27 = vpack.c.bf16 %v810_v22, %v807_v12  ;;  %v2601_v12 = vld [vmem:[#allocation8] sm:$0xff]  }
 0x248   : > { %v817_v28 = vpack.c.bf16 %v802_v25, %v799_v17  ;;  %2429 = vmatprep.mubr.bf16.mxu0 %v813_v24  ;;  %2441 = vmatprep.subr.bf16.mxu1 %v2601_v12  ;;  %v2606_v17 = vld [vmem:[#allocation8 + $0x28] sm:$0xff]  }
 0x249   : > { %v755_v29 = vpop.f32.mrb[4].mxu0  ;;  %2425 = vmatprep.subr.bf16.mxu0 %v815_v26  ;;  %2442 = vmatpush3.bf16.msra.mxu1 %v2601_v12  ;;  %v2632_v12 = vld [vmem:[#allocation10 + $0x6c] ss:$16 sps:$4 sm:$0xff]  }
 0x24a   : > { %v757_v31 = vpop.f32.mrb[5].mxu0  ;;  %2426 = vmatpush3.bf16.xpose.msra.mxu0 %v815_v26  ;;  %v756_v33 = vadd.f32 %v755_v29, %v571_v7  ;;  %2443 = vmatprep.subr.bf16.mxu1 %v2602_v13 }
 0x24b   : > { %v759_v32 = vpop.f32.mrb[6].mxu0  ;;  %v758_v36 = vadd.f32 %v757_v31, %v575_v9 }
 0x24c   : > { %v760_v34 = vadd.f32 %v759_v32, %v571_v7  ;;  %v761_v35 = vpop.f32.mrb[7].mxu0 }
 0x24d   : > { %v762_v37 = vadd.f32 %v761_v35, %v575_v9  ;;  %2444 = vmatpush3.bf16.msra.mxu1 %v2602_v13  ;;  %v2627_v13 = vld [vmem:[#allocation10 + $0x60] ss:$16 sps:$4 sm:$0xff]  }
 0x24e   : > { %v814_v38 = vpack.c.bf16 %v760_v34, %v756_v33  ;;  %2445 = vmatprep.subr.bf16.mxu1 %v2603_v14  ;;  %v2608_v34 = vld [vmem:[#allocation8 + $0x38] sm:$0xff]  }
 0x24f   : > { %v816_v39 = vpack.c.bf16 %v762_v37, %v758_v36 }
 0x251   : > { %2427 = vmatprep.subr.bf16.mxu0 %v816_v39  ;;  %2446 = vmatpush3.bf16.msra.mxu1 %v2603_v14  ;;  %v2630_v14 = vld [vmem:[#allocation10 + $0x68] ss:$16 sps:$4 sm:$0xff]  }
 0x252   : > { %2428 = vmatpush3.bf16.xpose.msra.mxu0 %v816_v39  ;;  %2447 = vmatprep.subr.bf16.mxu1 %v2604_v15 }
 0x253   : > { %2433 = vmatprep.subr.bf16.mxu0 %v817_v28 }
 0x255   : > { %2448 = vmatpush3.bf16.msra.mxu1 %v2604_v15  ;;  %v2638_v15 = vld [vmem:[#allocation10 + $0x8c] ss:$16 sps:$4 sm:$0xff]  }
 0x256   : > { %2449 = vmatprep.subr.bf16.mxu1 %v2605_v16 }
 0x259   : > { %2430 = vmatmul.mubr.bf16.vlgmr.msra.gmra.mrb[8].mxu0 %v814_v38  ;;  %2450 = vmatpush3.bf16.msra.mxu1 %v2605_v16  ;;  %v2633_v16 = vld [vmem:[#allocation10 + $0x80] ss:$16 sps:$4 sm:$0xff]  }
 0x25a   : > { %2434 = vmatpush3.bf16.msra.mxu0 %v817_v28  ;;  %2451 = vmatprep.subr.bf16.mxu1 %v2606_v17 }
 0x25b   : > { %2435 = vmatprep.subr.bf16.mxu0 %v818_v27 }
 0x25d   : > { %2452 = vmatpush3.bf16.msra.mxu1 %v2606_v17  ;;  %v2636_v17 = vld [vmem:[#allocation10 + $0x88] ss:$16 sps:$4 sm:$0xff]  }
 0x25e   : > { %2436 = vmatpush3.bf16.msra.mxu0 %v818_v27  ;;  %2453 = vmatprep.subr.bf16.mxu1 %v2607_v18 }
 0x261   : > { %2454 = vmatpush3.bf16.msra.mxu1 %v2607_v18  ;;  %v2641_v18 = vld [vmem:[#allocation10 + $0xa4] ss:$16 sps:$4 sm:$0xff]  }
 0x262   : > { %2455 = vmatprep.subr.bf16.mxu1 %v2608_v34 }
 0x265   : > { %2456 = vmatpush3.bf16.msra.mxu1 %v2608_v34 }
 0x32c   : > { %v2431_v40 = vpop.f32.mrb[8].mxu0 }
 0x32d   : > { %v853_v41 = vpop.f32.mrb[9].mxu0  ;;  %v875_v46 = vsel %vm868_vm0, %v2431_v40, -inf }
 0x32e   : > { %v2432_v42 = vpop.f32.mrb[10].mxu0  ;;  %v869_v43 = vsel %vm868_vm0, %v853_v41, -inf }
 0x32f   : > { %870 = vmax.xlane.f32.xlu0 %v869_v43  ;;  %v856_v44 = vpop.f32.mrb[11].mxu0  ;;  %v878_v47 = vsel %vm868_vm0, %v2432_v42, -inf  ;;  %v2612_v43 = vld [vmem:[#allocation10 + $0x8] ss:$16 sps:$4 sm:$0xff]  }
 0x330   : > { %v872_v45 = vsel %vm868_vm0, %v856_v44, -inf }
 0x331   : > { %873 = vmax.xlane.f32.xlu1 %v872_v45  ;;  %v2617_v45 = vld [vmem:[#allocation10 + $0x24] ss:$16 sps:$4 sm:$0xff]  }
 0x333   : > { %876 = vmax.xlane.f32.xlu0 %v875_v46  ;;  %v2620_v46 = vld [vmem:[#allocation10 + $0x2c] ss:$16 sps:$4 sm:$0xff]  }
 0x335   : > { %879 = vmax.xlane.f32.xlu1 %v878_v47  ;;  %v2615_v47 = vld [vmem:[#allocation10 + $0x20] ss:$16 sps:$4 sm:$0xff]  }
 0x3bc   : > { %v871_v48 = vpop.xlane.xlu0 %870 }
 0x3bd   : > { %v881_v49 = vsub.f32 %v853_v41, %v871_v48  ;;  %v2609_v41 = vld [vmem:[#allocation10] ss:$16 sps:$4 sm:$0xff]   ;;  %v2618_v48 = vld [vmem:[#allocation10 + $0x28] ss:$16 sps:$4 sm:$0xff]  }
 0x3be   : > { %v874_v50 = vpop.xlane.xlu1 %873 }
 0x3bf   : > { %v885_v51 = vmul.f32 1.442695, %v881_v49  ;;  %v882_v52 = vsub.f32 %v856_v44, %v874_v50  ;;  %v2614_v44 = vld [vmem:[#allocation10 + $0xc] ss:$16 sps:$4 sm:$0xff]   ;;  %v2623_v49 = vld [vmem:[#allocation10 + $0x44] ss:$16 sps:$4 sm:$0xff]  }
 0x3c0   : > { %v877_v53 = vpop.xlane.xlu0 %876  ;;  %1404 = vmatprep.subr.bf16.mxu1 %v2614_v44  ;;  %v2626_v50 = vld [vmem:[#allocation10 + $0x4c] ss:$16 sps:$4 sm:$0xff]  }
 0x3c1   : > { %2697 = vpow2.f32 %v885_v51  ;;  %v887_v54 = vmul.f32 1.442695, %v882_v52  ;;  %v883_v55 = vsub.f32 %v2431_v40, %v877_v53  ;;  %v2621_v51 = vld [vmem:[#allocation10 + $0x40] ss:$16 sps:$4 sm:$0xff]   ;;  %v2624_v52 = vld [vmem:[#allocation10 + $0x48] ss:$16 sps:$4 sm:$0xff]  }
 0x3c2   : > { %v880_v56 = vpop.xlane.xlu1 %879  ;;  %v2239_v53 = vld [vmem:[%s3660_s5] ss:$0 sm:$0xff] }
 0x3c3   : > { %2699 = vpow2.f32 %v887_v54  ;;  %v889_v57 = vmul.f32 1.442695, %v883_v55  ;;  %v884_v58 = vsub.f32 %v2432_v42, %v880_v56  ;;  %v2611_v42 = vld [vmem:[#allocation10 + $0x4] ss:$16 sps:$4 sm:$0xff]  }
 0x3c4   : > { %1351 = vmatprep.subr.bf16.mxu0 %v2611_v42 }
 0x3c5   : > { %2701 = vpow2.f32 %v889_v57  ;;  %v891_v59 = vmul.f32 1.442695, %v884_v58 }
 0x3c7   : > { %2703 = vpow2.f32 %v891_v59 }
 0x3cb   : > { %v2698_v60 = vpop.eup %2697 }
 0x3cc   : > { %v893_v3 = vsel %vm868_vm0, %v2698_v60, 0.0 }
 0x3cd   : > { %v2700_v6 = vpop.eup %2699  ;;  %894 = vadd.xlane.f32.xlu0 %v893_v3 }
 0x3ce   : > { %v896_v7 = vsel %vm868_vm0, %v2700_v6, 0.0 }
 0x3cf   : > { %v2702_v8 = vpop.eup %2701  ;;  %897 = vadd.xlane.f32.xlu1 %v896_v7 }
 0x3d0   : > { %v899_v9 = vsel %vm868_vm0, %v2702_v8, 0.0 }
 0x3d1   : > { %v2704_v10 = vpop.eup %2703  ;;  %900 = vadd.xlane.f32.xlu0 %v899_v9 }
 0x3d2   : > { %v902_v11 = vsel %vm868_vm0, %v2704_v10, 0.0 }
 0x3d3   : > { %903 = vadd.xlane.f32.xlu1 %v902_v11 }
 0x45a   : > { %v895_v19 = vpop.xlane.xlu0 %894 }
 0x45b   : > { %2705 = vrcp.f32 %v895_v19  ;;  %v2644_v19 = vld [vmem:[#allocation10 + $0xac] ss:$16 sps:$4 sm:$0xff]  }
 0x45c   : > { %v898_v20 = vpop.xlane.xlu1 %897 }
 0x45d   : > { %2707 = vrcp.f32 %v898_v20  ;;  %v2639_v20 = vld [vmem:[#allocation10 + $0xa0] ss:$16 sps:$4 sm:$0xff]  }
 0x45e   : > { %v901_v21 = vpop.xlane.xlu0 %900 }
 0x45f   : > { %2709 = vrcp.f32 %v901_v21  ;;  %v2642_v21 = vld [vmem:[#allocation10 + $0xa8] ss:$16 sps:$4 sm:$0xff]  }
 0x460   : > { %v904_v22 = vpop.xlane.xlu1 %903 }
 0x461   : > { %2711 = vrcp.f32 %v904_v22  ;;  %v2647_v22 = vld [vmem:[#allocation10 + $0xc4] ss:$16 sps:$4 sm:$0xff]  }
 0x465   : > { %v2706_v23 = vpop.eup %2705 }
 0x466   : > { %v909_v25 = vmul.f32 %v2706_v23, %v2698_v60  ;;  %v2650_v23 = vld [vmem:[#allocation10 + $0xcc] ss:$16 sps:$4 sm:$0xff]  }
 0x467   : > { %v2708_v24 = vpop.eup %2707 }
 0x468   : > { %v910_v26 = vmul.f32 %v2708_v24, %v2700_v6  ;;  %v2645_v24 = vld [vmem:[#allocation10 + $0xc0] ss:$16 sps:$4 sm:$0xff]  }
 0x469   : > { %v2710_v27 = vpop.eup %2709 }
 0x46a   : > { %v913_v28 = vpack.c.bf16 %v910_v26, %v909_v25  ;;  %v911_v31 = vmul.f32 %v2710_v27, %v2702_v8  ;;  %v2648_v25 = vld [vmem:[#allocation10 + $0xc8] ss:$16 sps:$4 sm:$0xff]   ;;  %v2653_v26 = vld [vmem:[#allocation10 + $0xe4] ss:$16 sps:$4 sm:$0xff]   ;;  %v2656_v27 = vld [vmem:[#allocation10 + $0xec] ss:$16 sps:$4 sm:$0xff]  }
 0x46b   : > { %v2712_v29 = vpop.eup %2711 }
 0x46c   : > { %v912_v32 = vmul.f32 %v2712_v29, %v2704_v10  ;;  %2437 = vmatprep.mubr.msk.bf16.mxu0 %vm868_vm0, %v913_v28  ;;  %v2651_v28 = vld [vmem:[#allocation10 + $0xe0] ss:$16 sps:$4 sm:$0xff]   ;;  %v2654_v29 = vld [vmem:[#allocation10 + $0xe8] ss:$16 sps:$4 sm:$0xff]  }
 0x46e   : > { %v914_v33 = vpack.c.bf16 %v912_v32, %v911_v31 }
 0x470   : > { %2438 = vmatmul.mubr.msk.bf16.vlgmr.msra.gmra.mrb[12].mxu0 %vm868_vm0, %v914_v33 }
 0x471   : > { %1383 = vmatprep.mubr.bf16.mxu0 %v3017_v30  ;;  %1352 = vmatpush1.bf16.msra.mxu0 %v2609_v41 }
 0x472   : > { %1353 = vmatprep.subr.bf16.mxu0 %v2617_v45 }
 0x475   : > { %1354 = vmatpush1.bf16.msra.mxu0 %v2615_v47 }
 0x476   : > { %1355 = vmatprep.subr.bf16.mxu0 %v2623_v49 }
 0x479   : > { %1356 = vmatpush1.bf16.msra.mxu0 %v2621_v51 }
 0x543   : > { %v2439_v35 = vpop.f32.mrb[12].mxu0 }
 0x544   : > { %v955_v36 = vpop.f32.mrb[13].mxu0 }
 0x545   : > { %v2440_v37 = vpop.f32.mrb[14].mxu0 }
 0x546   : > { %v971_v38 = vpack.c.bf16 %v2440_v37, %v2439_v35  ;;  %v958_v39 = vpop.f32.mrb[15].mxu0 }
 0x547   : > { %v970_v40 = vpack.c.bf16 %v958_v39, %v955_v36 }
 0x549   : > { %2457 = vmatprep.mubr.bf16.mxu1 %v970_v40 }
 0x54a   : > { %2458 = vmatmul.mubr.bf16.vlgmr.msra.gmra.mrb[4].mxu1 %v971_v38 }
 0x54b   : > { %1436 = vmatprep.mubr.bf16.mxu1 %v3017_v30  ;;  %1405 = vmatpush1.bf16.msra.mxu1 %v2612_v43 }
 0x54c   : > { %1406 = vmatprep.subr.bf16.mxu1 %v2620_v46  ;;  %v2248_v46 = vld [vmem:[%s3661_s6] ss:$0 sm:$0xff] }
 0x54f   : > { %1407 = vmatpush1.bf16.msra.mxu1 %v2618_v48 }
 0x550   : > { %1408 = vmatprep.subr.bf16.mxu1 %v2626_v50 }
 0x553   : > { %1409 = vmatpush1.bf16.msra.mxu1 %v2624_v52 }
 0x554   : > { %1410 = vmatprep.subr.bf16.mxu1 %v2632_v12  ;;  %v2667_v12 = vld [vmem:[#allocation11 + $0x10] sm:$0xff]  }
 0x557   : > { %1411 = vmatpush1.bf16.msra.mxu1 %v2630_v14  ;;  %v2669_v14 = vld [vmem:[#allocation11 + $0x58] sm:$0xff]  }
 0x558   : > { %1412 = vmatprep.subr.bf16.mxu1 %v2638_v15  ;;  %v2671_v15 = vld [vmem:[#allocation11 + $0x18] sm:$0xff]  }
 0x55b   : > { %1413 = vmatpush1.bf16.msra.mxu1 %v2636_v17  ;;  %v2673_v17 = vld [vmem:[#allocation11 + $0x60] sm:$0xff]  }
 0x55c   : > { %1414 = vmatprep.subr.bf16.mxu1 %v2644_v19  ;;  %v2675_v19 = vld [vmem:[#allocation11 + $0x20] sm:$0xff]  }
 0x55f   : > { %1415 = vmatpush1.bf16.msra.mxu1 %v2642_v21  ;;  %v2677_v21 = vld [vmem:[#allocation11 + $0x68] sm:$0xff]  }
 0x560   : > { %1416 = vmatprep.subr.bf16.mxu1 %v2650_v23  ;;  %v2679_v23 = vld [vmem:[#allocation11 + $0x28] sm:$0xff]  }
 0x563   : > { %1417 = vmatpush1.bf16.msra.mxu1 %v2648_v25  ;;  %v2681_v25 = vld [vmem:[#allocation11 + $0x70] sm:$0xff]  }
 0x564   : > { %1418 = vmatprep.subr.bf16.mxu1 %v2656_v27  ;;  %v2683_v27 = vld [vmem:[#allocation11 + $0x30] sm:$0xff]  }
 0x567   : > { %1419 = vmatpush1.bf16.msra.mxu1 %v2654_v29  ;;  %v2685_v29 = vld [vmem:[#allocation11 + $0x78] sm:$0xff]  }
 0x61d   : > { %v2459_v54 = vpop.f32.mrb[4].mxu1 }
 0x61e   : > { %v1077_v55 = vpop.f32.mrb[5].mxu1  ;;  %v1086_v56 = vadd.f32 %v2459_v54, %v2239_v53 }
 0x61f   : > { %v1078_v57 = vadd.f32 %v2239_v53, %v1077_v55  ;;  %v2460_v58 = vpop.f32.mrb[6].mxu1 }
 0x620   : > { %v1080_v59 = vpop.f32.mrb[7].mxu1  ;;  %v1089_v3 = vadd.f32 %v2460_v58, %v2239_v53  ;;  %v3396_v7 = vadd.f32 %v1086_v56, %v3343_v1  ;;  %v2657_v58 = vld [vmem:[#allocation11 + $0x40] sm:$0xff]  }
 0x621   : > { %v3393_v60 = vadd.f32 %v1078_v57, %v3341_v0  ;;  %v1081_v6 = vadd.f32 %v2239_v53, %v1080_v59  ;;  %v2658_v59 = vld [vmem:[#allocation11 + $0xc0] sm:$0xff]  }
 0x622   : > { %v3404_v10 = vadd.f32 %v1089_v3, %v3351_v5  ;;  %v1098_v0 = vmul.f32 %v3396_v7, %v3396_v7  ;;  %v2635_v5 = vld [vmem:[#allocation10 + $0x84] ss:$16 sps:$4 sm:$0xff]   ;;  %2377 = vmatprep.subr.bf16.mxu1 %v2658_v59 }
 0x623   : > { %v3399_v8 = vadd.f32 %v1081_v6, %v3345_v2  ;;  %v1096_v9 = vmul.f32 %v3393_v60, %v3393_v60  ;;  %v2629_v2 = vld [vmem:[#allocation10 + $0x64] ss:$16 sps:$4 sm:$0xff]  }
 0x624   : > { %v1099_v1 = vmul.f32 %v3404_v10, %v3404_v10  ;;  %1357 = vmatprep.subr.bf16.mxu0 %v2629_v2  ;;  %v2659_v3 = vld [vmem:[#allocation11] sm:$0xff]   ;;  %v2666_v2 = vld [vmem:[#allocation11 + $0xd0] sm:$0xff]  }
 0x625   : > { %1100 = vadd.xlane.f32.xlu0 %v1096_v9  ;;  %v1097_v11 = vmul.f32 %v3399_v8, %v3399_v8  ;;  %1358 = vmatpush1.bf16.msra.mxu0 %v2627_v13  ;;  %v2660_v6 = vld [vmem:[#allocation11 + $0x80] sm:$0xff]   ;;  %v2661_v9 = vld [vmem:[#allocation11 + $0x48] sm:$0xff]   ;;  %v2668_v13 = vld [vmem:[#allocation11 + $0x90] sm:$0xff]  }
 0x626   : > { %1359 = vmatprep.subr.bf16.mxu0 %v2635_v5  ;;  %v2670_v5 = vld [vmem:[#allocation11 + $0xd8] sm:$0xff]  }
 0x627   : > { %1102 = vadd.xlane.f32.xlu1 %v1097_v11  ;;  %v2662_v11 = vld [vmem:[#allocation11 + $0xc8] sm:$0xff]  }
 0x629   : > { %1104 = vadd.xlane.f32.xlu0 %v1098_v0  ;;  %1360 = vmatpush1.bf16.msra.mxu0 %v2633_v16  ;;  %v2663_v0 = vld [vmem:[#allocation11 + $0x8] sm:$0xff]   ;;  %v2672_v16 = vld [vmem:[#allocation11 + $0x98] sm:$0xff]  }
 0x62a   : > { %1361 = vmatprep.subr.bf16.mxu0 %v2641_v18  ;;  %v2674_v18 = vld [vmem:[#allocation11 + $0xe0] sm:$0xff]  }
 0x62b   : > { %1106 = vadd.xlane.f32.xlu1 %v1099_v1  ;;  %v2664_v1 = vld [vmem:[#allocation11 + $0x88] sm:$0xff]  }
 0x62d   : > { %1362 = vmatpush1.bf16.msra.mxu0 %v2639_v20  ;;  %v2676_v20 = vld [vmem:[#allocation11 + $0xa0] sm:$0xff]  }
 0x62e   : > { %1363 = vmatprep.subr.bf16.mxu0 %v2647_v22  ;;  %v2678_v22 = vld [vmem:[#allocation11 + $0xe8] sm:$0xff]  }
 0x631   : > { %1364 = vmatpush1.bf16.msra.mxu0 %v2645_v24  ;;  %v2680_v24 = vld [vmem:[#allocation11 + $0xa8] sm:$0xff]  }
 0x632   : > { %1365 = vmatprep.subr.bf16.mxu0 %v2653_v26  ;;  %v2682_v26 = vld [vmem:[#allocation11 + $0xf0] sm:$0xff]  }
 0x635   : > { %1366 = vmatpush1.bf16.msra.mxu0 %v2651_v28  ;;  %v2684_v28 = vld [vmem:[#allocation11 + $0xb0] sm:$0xff]  }
 0x636   : > { %2349 = vmatprep.subr.bf16.mxu0 %v2657_v58 }
 0x6b2   : > { %v1101_v31 = vpop.xlane.xlu0 %1100 }
 0x6b3   : > { %v1108_v32 = vmul.f32 0.0078125, %v1101_v31  ;;  %v2686_v31 = vld [vmem:[#allocation11 + $0xf8] sm:$0xff]  }
 0x6b4   : > { %v1103_v33 = vpop.xlane.xlu1 %1102 }
 0x6b5   : > { %v1112_v34 = vadd.f32 1e-06, %v1108_v32  ;;  %v1109_v35 = vmul.f32 0.0078125, %v1103_v33  ;;  %v2687_v32 = vld [vmem:[#allocation11 + $0x38] sm:$0xff]  }
 0x6b6   : > { %v1105_v36 = vpop.xlane.xlu0 %1104  ;;  %v2688_v33 = vld [vmem:[#allocation11 + $0xb8] sm:$0xff]  }
 0x6b7   : > { %2713 = vrsqrt.f32 %v1112_v34  ;;  %v1113_v37 = vadd.f32 1e-06, %v1109_v35  ;;  %v1110_v38 = vmul.f32 0.0078125, %v1105_v36  ;;  %v1169_v34 = vld [vmem:[%s3663_s8] sm:$0xf]  ;;  %v1185_v35 = vsub.s32 3, %v3363_v61 }
 0x6b8   : > { %v1107_v39 = vpop.xlane.xlu1 %1106  ;;  %v1174_v36 = vrot.slane %v1169_v34, %v570_v63 }
 0x6b9   : > { %2715 = vrsqrt.f32 %v1113_v37  ;;  %v1114_v40 = vadd.f32 1e-06, %v1110_v38  ;;  %v1111_v41 = vmul.f32 0.0078125, %v1107_v39  ;;  %v1182_v37 = vrot.slane %v1169_v34, %v578_v62 }
 0x6bb   : > { %v1115_v42 = vadd.f32 1e-06, %v1111_v41  ;;  %2717 = vrsqrt.f32 %v1114_v40  ;;  %v1178_v40 = vrot.slane %v1169_v34, %v574_v4  ;;  %v1186_v41 = vrot.slane %v1169_v34, %v1185_v35 }
 0x6bd   : > { %2719 = vrsqrt.f32 %v1115_v42 }
 0x6c1   : > { %v2714_v43 = vpop.eup %2713 }
 0x6c2   : > { %v1120_v44 = vmul.f32 %v2714_v43, %v3393_v60 }
 0x6c3   : > { %v2716_v45 = vpop.eup %2715 }
 0x6c4   : > { %v1121_v47 = vmul.f32 %v2716_v45, %v3399_v8  ;;  %v1131_v49 = vmul.f32 %v2248_v46, %v1120_v44 }
 0x6c5   : > { %v2718_v48 = vpop.eup %2717 }
 0x6c6   : > { %v1132_v50 = vmul.f32 %v2248_v46, %v1121_v47  ;;  %v1122_v54 = vmul.f32 %v2718_v48, %v3396_v7 }
 0x6c7   : > { %v2720_v51 = vpop.eup %2719 }
 0x6c8   : > { %v1135_v52 = vpack.c.bf16 %v1132_v50, %v1131_v49  ;;  %v1123_v53 = vmul.f32 %v2720_v51, %v3404_v10  ;;  %v1133_v56 = vmul.f32 %v2248_v46, %v1122_v54 }
 0x6ca   : > { %1384 = vmatmul.mubr.bf16.vlgmr.msra.gmra.mrb[16].mxu0 %v1135_v52  ;;  %1437 = vmatmul.mubr.bf16.vlgmr.msra.gmra.mrb[8].mxu1 %v1135_v52  ;;  %v1134_v55 = vmul.f32 %v2248_v46, %v1123_v53 }
 0x6cb   : > { %1393 = vmatprep.mubr.bf16.mxu0 %v3017_v30  ;;  %1446 = vmatprep.mubr.bf16.mxu1 %v3017_v30  ;;  %v2665_v30 = vld [vmem:[#allocation11 + $0x50] sm:$0xff]  }
 0x6cc   : > { %v1136_v57 = vpack.c.bf16 %v1134_v55, %v1133_v56  ;;  %2350 = vmatpush3.bf16.msra.mxu0 %v2659_v3  ;;  %2378 = vmatpush3.bf16.msra.mxu1 %v2660_v6 }
 0x6cd   : > { %2351 = vmatprep.subr.bf16.mxu0 %v2661_v9  ;;  %2379 = vmatprep.subr.bf16.mxu1 %v2662_v11 }
 0x6d0   : > { %2352 = vmatpush3.bf16.msra.mxu0 %v2663_v0  ;;  %2380 = vmatpush3.bf16.msra.mxu1 %v2664_v1 }
 0x6d1   : > { %2353 = vmatprep.subr.bf16.mxu0 %v2665_v30  ;;  %2381 = vmatprep.subr.bf16.mxu1 %v2666_v2 }
 0x6d2   : > { %1394 = vmatmul.mubr.bf16.gmra.mrb[20].mxu0 %v1136_v57  ;;  %1447 = vmatmul.mubr.bf16.gmra.mrb[12].mxu1 %v1136_v57 }
 0x6d4   : > { %2354 = vmatpush3.bf16.msra.mxu0 %v2667_v12  ;;  %2382 = vmatpush3.bf16.msra.mxu1 %v2668_v13 }
 0x6d5   : > { %2355 = vmatprep.subr.bf16.mxu0 %v2669_v14  ;;  %2383 = vmatprep.subr.bf16.mxu1 %v2670_v5 }
 0x6d8   : > { %2356 = vmatpush3.bf16.msra.mxu0 %v2671_v15  ;;  %2384 = vmatpush3.bf16.msra.mxu1 %v2672_v16 }
 0x6d9   : > { %2357 = vmatprep.subr.bf16.mxu0 %v2673_v17  ;;  %2385 = vmatprep.subr.bf16.mxu1 %v2674_v18 }
 0x6dc   : > { %2358 = vmatpush3.bf16.msra.mxu0 %v2675_v19  ;;  %2386 = vmatpush3.bf16.msra.mxu1 %v2676_v20 }
 0x6dd   : > { %2359 = vmatprep.subr.bf16.mxu0 %v2677_v21  ;;  %2387 = vmatprep.subr.bf16.mxu1 %v2678_v22 }
 0x6e0   : > { %2360 = vmatpush3.bf16.msra.mxu0 %v2679_v23  ;;  %2388 = vmatpush3.bf16.msra.mxu1 %v2680_v24 }
 0x6e1   : > { %2361 = vmatprep.subr.bf16.mxu0 %v2681_v25  ;;  %2389 = vmatprep.subr.bf16.mxu1 %v2682_v26 }
 0x6e4   : > { %2362 = vmatpush3.bf16.msra.mxu0 %v2683_v27  ;;  %2390 = vmatpush3.bf16.msra.mxu1 %v2684_v28 }
 0x6e5   : > { %2363 = vmatprep.subr.bf16.mxu0 %v2685_v29  ;;  %2391 = vmatprep.subr.bf16.mxu1 %v2686_v31 }
 0x6e8   : > { %2364 = vmatpush3.bf16.msra.mxu0 %v2687_v32  ;;  %2392 = vmatpush3.bf16.msra.mxu1 %v2688_v33 }
 0x79d   : > { %v1385_v38 = vpop.f32.mrb[16].mxu0  ;;  %v1438_v39 = vpop.f32.mrb[8].mxu1 }
 0x79e   : > { %v1387_v42 = vpop.f32.mrb[17].mxu0  ;;  %v1440_v43 = vpop.f32.mrb[9].mxu1  ;;  %v1386_v46 = vadd.f32 %v1385_v38, %v1174_v36  ;;  %v1439_v47 = vadd.f32 %v1438_v39, %v1182_v37 }
 0x79f   : > { %v1389_v44 = vpop.f32.mrb[18].mxu0  ;;  %v1442_v45 = vpop.f32.mrb[10].mxu1  ;;  %v1388_v63 = vadd.f32 %v1387_v42, %v1178_v40  ;;  %v1441_v52 = vadd.f32 %v1440_v43, %v1186_v41 }
 0x7a0   : > { %v1390_v48 = vadd.f32 %v1389_v44, %v1174_v36  ;;  %v1443_v49 = vadd.f32 %v1442_v45, %v1182_v37  ;;  %v1391_v50 = vpop.f32.mrb[19].mxu0  ;;  %v1444_v51 = vpop.f32.mrb[11].mxu1 }
 0x7a1   : > { %v1392_v53 = vadd.f32 %v1391_v50, %v1178_v40  ;;  %v1445_v62 = vadd.f32 %v1444_v51, %v1186_v41 }
 0x7a2   : > { %v3431_v54 = vpack.c.bf16 %v1390_v48, %v1386_v46  ;;  %v3433_v55 = vpack.c.bf16 %v1443_v49, %v1439_v47 }
 0x7a3   : > { %v3435_v61 = vpack.c.bf16 %v1392_v53, %v1388_v63  ;;  %v3437_v4 = vpack.c.bf16 %v1445_v62, %v1441_v52 }
 0x7a4   : > { %v1473_v56 = vmul.bf16 1060454197, %v3431_v54  ;;  %v1475_v57 = vmul.bf16 1060454197, %v3433_v55  ;;  %v1465_v46 = vmul.bf16 1056980736, %v3431_v54 }
 0x7a5   : > { %v1474_v58 = vmul.bf16 1060454197, %v3435_v61  ;;  %v1395_v3 = vpop.f32.mrb[20].mxu0  ;;  %v1476_v0 = vmul.bf16 1060454197, %v3437_v4  ;;  %v1448_v1 = vpop.f32.mrb[12].mxu1 }
 0x7a6   : > { %v1481_v59 = vand.u32 2147450879, %v1473_v56  ;;  %v1483_v6 = vand.u32 2147450879, %v1475_v57  ;;  %v1397_v14 = vpop.f32.mrb[21].mxu0  ;;  %v1450_v15 = vpop.f32.mrb[13].mxu1  ;;  %v1396_v23 = vadd.f32 %v1395_v3, %v1174_v36  ;;  %v1449_v24 = vadd.f32 %v1448_v1, %v1182_v37 }
 0x7a7   : > { %v1482_v9 = vand.u32 2147450879, %v1474_v58  ;;  %v3451_v13 = vand.u32 2147450879, %v1476_v0  ;;  %v1399_v16 = vpop.f32.mrb[22].mxu0  ;;  %v1452_v19 = vpop.f32.mrb[14].mxu1  ;;  %v1398_v25 = vadd.f32 %v1397_v14, %v1178_v40  ;;  %v1451_v28 = vadd.f32 %v1450_v15, %v1186_v41 }
 0x7a8   : > { %v1489_v11 = vmul.bf16 1051213480, %v1481_v59  ;;  %v1491_v30 = vmul.bf16 1051213480, %v1483_v6  ;;  %v1401_v20 = vpop.f32.mrb[23].mxu0  ;;  %v1454_v21 = vpop.f32.mrb[15].mxu1  ;;  %v1400_v26 = vadd.f32 %v1399_v16, %v1174_v36  ;;  %v1453_v27 = vadd.f32 %v1452_v19, %v1182_v37 }
 0x7a9   : > { %v1490_v2 = vmul.bf16 1051213480, %v1482_v9  ;;  %v1492_v18 = vmul.bf16 1051213480, %v3451_v13  ;;  %v1402_v29 = vadd.f32 %v1401_v20, %v1178_v40  ;;  %v1455_v31 = vadd.f32 %v1454_v21, %v1186_v41 }
 0x7aa   : > { %v1497_v12 = vadd.bf16 1065369472, %v1489_v11  ;;  %v1499_v5 = vadd.bf16 1065369472, %v1491_v30  ;;  %v3454_v32 = vpack.c.bf16 %v1400_v26, %v1396_v23  ;;  %v3456_v33 = vpack.c.bf16 %v1453_v27, %v1449_v24 }
 0x7ab   : > { %v1498_v17 = vadd.bf16 1065369472, %v1490_v2  ;;  %v1500_v22 = vadd.bf16 1065369472, %v1492_v18  ;;  %v3458_v34 = vpack.c.bf16 %v1402_v29, %v1398_v25  ;;  %v3460_v35 = vpack.c.bf16 %v1455_v31, %v1451_v28 }
 0x7ac   : > { %2721 = vrcp.bf16 %v1497_v12  ;;  %v1593_v38 = vsub.bf16 0, %v1481_v59  ;;  %v1477_v39 = vmul.bf16 1060454197, %v3454_v32  ;;  %v1595_v42 = vsub.bf16 0, %v1483_v6 }
 0x7ad   : > { %2723 = vrcp.bf16 %v1499_v5  ;;  %v1479_v36 = vmul.bf16 1060454197, %v3456_v33  ;;  %v1478_v37 = vmul.bf16 1060454197, %v3458_v34  ;;  %v1594_v41 = vsub.bf16 0, %v1482_v9 }
 0x7ae   : > { %2725 = vrcp.bf16 %v1498_v17  ;;  %v1485_v40 = vand.u32 2147450879, %v1477_v39  ;;  %v1601_v47 = vmul.bf16 %v1593_v38, %v1481_v59  ;;  %v1603_v51 = vmul.bf16 %v1595_v42, %v1483_v6 }
 0x7af   : > { %2727 = vrcp.bf16 %v1500_v22  ;;  %v1487_v43 = vand.u32 2147450879, %v1479_v36  ;;  %v3471_v44 = vand.u32 2147450879, %v1478_v37  ;;  %v1480_v52 = vmul.bf16 1060454197, %v3460_v35 }
 0x7b0   : > { %v1493_v48 = vmul.bf16 1051213480, %v1485_v40  ;;  %v1602_v1 = vmul.bf16 %v1594_v41, %v1482_v9  ;;  %v1596_v30 = vsub.bf16 0, %v3451_v13  ;;  %v1610_v12 = vmul.bf16 1069105081, %v1601_v47 }
 0x7b1   : > { %v1495_v63 = vmul.bf16 1051213480, %v1487_v43  ;;  %v1494_v3 = vmul.bf16 1051213480, %v3471_v44  ;;  %v1616_v15 = vmul.bf16 1069105081, %v1603_v51 }
 0x7b2   : > { %v1501_v62 = vadd.bf16 1065369472, %v1493_v48  ;;  %v1597_v19 = vsub.bf16 0, %v1485_v40  ;;  %v3487_v9 = vand.u32 2147450879, %v1480_v52  ;;  %v1604_v23 = vmul.bf16 %v1596_v30, %v3451_v13 }
 0x7b3   : > { %v1503_v2 = vadd.bf16 1065369472, %v1495_v63  ;;  %v1502_v6 = vadd.bf16 1065369472, %v1494_v3  ;;  %v1613_v21 = vmul.bf16 1069105081, %v1602_v1 }
 0x7b4   : > { %2729 = vrcp.bf16 %v1501_v62  ;;  %v1599_v25 = vsub.bf16 0, %v1487_v43  ;;  %v1496_v26 = vmul.bf16 1051213480, %v3487_v9  ;;  %v1605_v38 = vmul.bf16 %v1597_v19, %v1485_v40 }
 0x7b5   : > { %2731 = vrcp.bf16 %v1503_v2  ;;  %v1598_v51 = vsub.bf16 0, %v3471_v44  ;;  %v1466_v62 = vmul.bf16 1056980736, %v3435_v61  ;;  %v1468_v1 = vmul.bf16 1056980736, %v3437_v4 }
 0x7b6   : > { %2733 = vrcp.bf16 %v1502_v6  ;;  %v1504_v42 = vadd.bf16 1065369472, %v1496_v26  ;;  %v1622_v30 = vmul.bf16 1069105081, %v1605_v38  ;;  %vm3519_vm1 = vcmp.lt.bf16.partialorder %v1473_v56, 0 }
 0x7b7   : > { %v2722_v45 = vpop.eup %2721  ;;  %2735 = vpow.bf16 %v1610_v12  ;;  %vm3528_vm2 = vcmp.lt.bf16.partialorder %v1475_v57, 0  ;;  %vm3540_vm3 = vcmp.lt.bf16.partialorder %v1474_v58, 0  ;;  %vm3553_vm4 = vcmp.lt.bf16.partialorder %v1476_v0, 0 }
 0x7b8   : > { %v2724_v49 = vpop.eup %2723  ;;  %v3474_v50 = vmul.bf16 1065369472, %v2722_v45  ;;  %2737 = vpow.bf16 %v1616_v15  ;;  %v1619_v45 = vmul.bf16 1069105081, %v1604_v23  ;;  %vm1653_vm5 = vcmp.lt.bf16.partialorder %v1477_v39, 0 }
 0x7b9   : > { %v3477_v53 = vmul.bf16 1065369472, %v2724_v49  ;;  %v2726_v59 = vpop.eup %2725  ;;  %v1607_v49 = vmul.bf16 %v1599_v25, %v1487_v43  ;;  %2739 = vrcp.bf16 %v1504_v42  ;;  %vm1654_vm6 = vcmp.lt.bf16.partialorder %v1478_v37, 0 }
 0x7ba   : > { %v1521_v11 = vmul.bf16 1065893768, %v3474_v50  ;;  %v3483_v16 = vmul.bf16 1065369472, %v2726_v59  ;;  %v2728_v17 = vpop.eup %2727  ;;  %2741 = vpow.bf16 %v1613_v21  ;;  %vm1655_vm7 = vcmp.lt.bf16.partialorder %v1479_v36, 0 }
 0x7bb   : > { %v1523_v14 = vmul.bf16 1065893768, %v3477_v53  ;;  %v3490_v22 = vmul.bf16 1065369472, %v2728_v17  ;;  %2743 = vpow.bf16 %v1619_v45  ;;  %v1628_v15 = vmul.bf16 1069105081, %v1607_v49 }
 0x7bc   : > { %v1529_v5 = vadd.bf16 3216687034, %v1521_v11  ;;  %v1522_v28 = vmul.bf16 1065893768, %v3483_v16  ;;  %v1606_v17 = vmul.bf16 %v1598_v51, %v3471_v44  ;;  %2745 = vpow.bf16 %v1622_v30 }
 0x7bd   : > { %v1531_v18 = vadd.bf16 3216687034, %v1523_v14  ;;  %v1524_v29 = vmul.bf16 1065893768, %v3490_v22  ;;  %2747 = vpow.bf16 %v1628_v15  ;;  %vm1656_vm8 = vcmp.lt.bf16.partialorder %v1480_v52, 0 }
 0x7be   : > { %v1537_v20 = vmul.bf16 %v1529_v5, %v3474_v50  ;;  %v1530_v13 = vadd.bf16 3216687034, %v1522_v28  ;;  %v1625_v45 = vmul.bf16 1069105081, %v1606_v17  ;;  %v2281_v52 = vld [vmem:[%s3665_s10] ss:$0 sm:$0xff] }
 0x7bf   : > { %v1539_v24 = vmul.bf16 %v1531_v18, %v3477_v53  ;;  %v1532_v47 = vadd.bf16 3216687034, %v1524_v29  ;;  %v2730_v2 = vpop.eup %2729 }
 0x7c0   : > { %v1545_v27 = vadd.bf16 1068908470, %v1537_v20  ;;  %v1538_v3 = vmul.bf16 %v1530_v13, %v3483_v16  ;;  %v2732_v14 = vpop.eup %2731  ;;  %v3506_v5 = vmul.bf16 1065369472, %v2730_v2  ;;  %2749 = vpow.bf16 %v1625_v45 }
 0x7c1   : > { %v1547_v31 = vadd.bf16 1068908470, %v1539_v24  ;;  %v1540_v11 = vmul.bf16 %v1532_v47, %v3490_v22  ;;  %v3509_v19 = vmul.bf16 1065369472, %v2732_v14  ;;  %v1600_v24 = vsub.bf16 0, %v3487_v9  ;;  %v2734_v26 = vpop.eup %2733 }
 0x7c2   : > { %v1553_v41 = vmul.bf16 %v1545_v27, %v3474_v50  ;;  %v1546_v43 = vadd.bf16 1068908470, %v1538_v3  ;;  %v1525_v25 = vmul.bf16 1065893768, %v3506_v5 }
 0x7c3   : > { %v1555_v48 = vmul.bf16 %v1547_v31, %v3477_v53  ;;  %v1548_v12 = vadd.bf16 1068908470, %v1540_v11  ;;  %v1527_v44 = vmul.bf16 1065893768, %v3509_v19  ;;  %v2736_v31 = vpop.eup %2735 }
 0x7c4   : > { %v1561_v63 = vadd.bf16 3197288082, %v1553_v41  ;;  %v1554_v20 = vmul.bf16 %v1546_v43, %v3483_v16  ;;  %v3524_v41 = vmul.bf16 1065369472, %v2734_v26  ;;  %v1533_v13 = vadd.bf16 3216687034, %v1525_v25  ;;  %v2738_v47 = vpop.eup %2737 }
 0x7c5   : > { %v1563_v40 = vadd.bf16 3197288082, %v1555_v48  ;;  %v1556_v21 = vmul.bf16 %v1548_v12, %v3490_v22  ;;  %v1535_v51 = vadd.bf16 3216687034, %v1527_v44 }
 0x7c6   : > { %v1569_v59 = vmul.bf16 %v1561_v63, %v3474_v50  ;;  %v1562_v28 = vadd.bf16 3197288082, %v1554_v20  ;;  %v1526_v3 = vmul.bf16 1065893768, %v3524_v41  ;;  %v1541_v11 = vmul.bf16 %v1533_v13, %v3506_v5 }
 0x7c7   : > { %v1571_v6 = vmul.bf16 %v1563_v40, %v3477_v53  ;;  %v1564_v29 = vadd.bf16 3197288082, %v1556_v21  ;;  %v2740_v40 = vpop.eup %2739  ;;  %v1543_v57 = vmul.bf16 %v1535_v51, %v3509_v19 }
 0x7c8   : > { %v1577_v18 = vadd.bf16 1048723074, %v1569_v59  ;;  %v1570_v49 = vmul.bf16 %v1562_v28, %v3483_v16  ;;  %v3544_v14 = vmul.bf16 1065369472, %v2740_v40  ;;  %v1549_v21 = vadd.bf16 1068908470, %v1541_v11 }
 0x7c9   : > { %v1579_v23 = vadd.bf16 1048723074, %v1571_v6  ;;  %v1572_v56 = vmul.bf16 %v1564_v29, %v3490_v22  ;;  %v2742_v6 = vpop.eup %2741  ;;  %v1551_v26 = vadd.bf16 1068908470, %v1543_v57 }
 0x7ca   : > { %v1585_v27 = vmul.bf16 %v1577_v18, %v3474_v50  ;;  %v1578_v2 = vadd.bf16 1048723074, %v1570_v49  ;;  %v1528_v58 = vmul.bf16 1065893768, %v3544_v14  ;;  %v1557_v29 = vmul.bf16 %v1549_v21, %v3506_v5 }
 0x7cb   : > { %v1587_v42 = vmul.bf16 %v1579_v23, %v3477_v53  ;;  %v1608_v53 = vmul.bf16 %v1600_v24, %v3487_v9  ;;  %v1580_v59 = vadd.bf16 1048723074, %v1572_v56  ;;  %v1534_v9 = vadd.bf16 3216687034, %v1526_v3  ;;  %v2744_v23 = vpop.eup %2743 }
 0x7cc   : > { %v1633_v48 = vmul.bf16 %v2736_v31, %v1585_v27  ;;  %v1586_v18 = vmul.bf16 %v1578_v2, %v3483_v16  ;;  %v2746_v31 = vpop.eup %2745  ;;  %v1565_v51 = vadd.bf16 3197288082, %v1557_v29 }
 0x7cd   : > { %v1635_v63 = vmul.bf16 %v2738_v47, %v1587_v42  ;;  %v1588_v20 = vmul.bf16 %v1580_v59, %v3490_v22  ;;  %v1542_v25 = vmul.bf16 %v1534_v9, %v3524_v41  ;;  %v1631_v27 = vmul.bf16 1069105081, %v1608_v53 }
 0x7ce   : > { %v1641_v30 = vsub.bf16 1065369472, %v1633_v48  ;;  %v1634_v28 = vmul.bf16 %v2742_v6, %v1586_v18  ;;  %v1536_v22 = vadd.bf16 3216687034, %v1528_v58  ;;  %v1559_v48 = vmul.bf16 %v1551_v26, %v3509_v19 }
 0x7cf   : > { %v1643_v43 = vsub.bf16 1065369472, %v1635_v63  ;;  %v1636_v15 = vmul.bf16 %v2744_v23, %v1588_v20  ;;  %v1550_v16 = vadd.bf16 1068908470, %v1542_v25  ;;  %2751 = vpow.bf16 %v1631_v27 }
 0x7d0   : > { %v1657_v17 = vsub.bf16 0, %v1641_v30  ;;  %v1642_v13 = vsub.bf16 1065369472, %v1634_v28  ;;  %v1544_v0 = vmul.bf16 %v1536_v22, %v3544_v14  ;;  %v1567_v53 = vadd.bf16 3197288082, %v1559_v48 }
 0x7d1   : > { %v1659_v24 = vsub.bf16 0, %v1643_v43  ;;  %v1644_v47 = vsub.bf16 1065369472, %v1636_v15  ;;  %v1558_v56 = vmul.bf16 %v1550_v16, %v3524_v41  ;;  %v1573_v40 = vmul.bf16 %v1565_v51, %v3506_v5 }
 0x7d2   : > { %v1665_v42 = vsel %vm3519_vm1, %v1657_v17, %v1641_v30  ;;  %v1658_v45 = vsub.bf16 0, %v1642_v13  ;;  %v1552_v38 = vadd.bf16 1068908470, %v1544_v0  ;;  %v1575_v59 = vmul.bf16 %v1567_v53, %v3509_v19  ;;  %v2748_v17 = vpop.eup %2747 }
 0x7d3   : > { %v1667_v49 = vsel %vm3528_vm2, %v1659_v24, %v1643_v43  ;;  %v1660_v63 = vsub.bf16 0, %v1644_v47  ;;  %v1673_v3 = vadd.bf16 1065369472, %v1665_v42  ;;  %v1566_v11 = vadd.bf16 3197288082, %v1558_v56 }
 0x7d4   : > { %v1675_v30 = vadd.bf16 1065369472, %v1667_v49  ;;  %v1666_v2 = vsel %vm3540_vm3, %v1658_v45, %v1642_v13  ;;  %v1560_v6 = vmul.bf16 %v1552_v38, %v3544_v14  ;;  %v1467_v18 = vmul.bf16 1056980736, %v3433_v55 }
 0x7d5   : > { %v1668_v50 = vsel %vm3553_vm4, %v1660_v63, %v1644_v47  ;;  %v1674_v57 = vadd.bf16 1065369472, %v1666_v2  ;;  %v1574_v9 = vmul.bf16 %v1566_v11, %v3524_v41  ;;  %v1581_v20 = vadd.bf16 1048723074, %v1573_v40 }
 0x7d6   : > { %v1676_v43 = vadd.bf16 1065369472, %v1668_v50  ;;  %v1583_v21 = vadd.bf16 1048723074, %v1575_v59  ;;  %v1568_v25 = vadd.bf16 3197288082, %v1560_v6  ;;  %v1681_v58 = vmul.bf16 %v1673_v3, %v1465_v46 }
 0x7d7   : > { %v1682_v12 = vmul.bf16 %v1674_v57, %v1466_v62  ;;  %v1582_v24 = vadd.bf16 1048723074, %v1574_v9  ;;  %v1683_v26 = vmul.bf16 %v1675_v30, %v1467_v18  ;;  %v1589_v27 = vmul.bf16 %v1581_v20, %v3506_v5  ;;  %v2750_v62 = vpop.eup %2749 }
 0x7d8   : > { %v1684_v23 = vmul.bf16 %v1676_v43, %v1468_v1  ;;  %v1591_v28 = vmul.bf16 %v1583_v21, %v3509_v19  ;;  %v1576_v61 = vmul.bf16 %v1568_v25, %v3544_v14  ;;  %v1470_v49 = vmul.bf16 1056980736, %v3458_v34 }
 0x7d9   : > { %1984 = vmatprep.mubr.bf16.mxu0 %v1682_v12  ;;  %v1590_v55 = vmul.bf16 %v1582_v24, %v3524_v41  ;;  %v1637_v4 = vmul.bf16 %v2746_v31, %v1589_v27  ;;  %v1469_v0 = vmul.bf16 1056980736, %v3454_v32  ;;  %v1472_v53 = vmul.bf16 1056980736, %v3460_v35 }
 0x7da   : > { %2033 = vmatprep.mubr.bf16.mxu1 %v1684_v23  ;;  %1985 = vmatmul.mubr.bf16.vlgmr.msra.gmra.mrb[24].mxu0 %v1681_v58  ;;  %v1639_v1 = vmul.bf16 %v2748_v17, %v1591_v28  ;;  %v1584_v29 = vadd.bf16 1048723074, %v1576_v61  ;;  %v2752_v44 = vpop.eup %2751  ;;  %v1471_v3 = vmul.bf16 1056980736, %v3456_v33 }
 0x7db   : > { %2034 = vmatmul.mubr.bf16.vlgmr.msra.gmra.mrb[16].mxu1 %v1683_v26  ;;  %v1638_v15 = vmul.bf16 %v2750_v62, %v1590_v55  ;;  %v1645_v54 = vsub.bf16 1065369472, %v1637_v4 }
 0x7dc   : > { %v1647_v46 = vsub.bf16 1065369472, %v1639_v1  ;;  %v1592_v5 = vmul.bf16 %v1584_v29, %v3544_v14 }
 0x7dd   : > { %v1646_v16 = vsub.bf16 1065369472, %v1638_v15  ;;  %v1661_v19 = vsub.bf16 0, %v1645_v54 }
 0x7de   : > { %v1663_v22 = vsub.bf16 0, %v1647_v46  ;;  %v1640_v42 = vmul.bf16 %v2752_v44, %v1592_v5 }
 0x7df   : > { %v1662_v41 = vsub.bf16 0, %v1646_v16  ;;  %v1669_v31 = vsel %vm1653_vm5, %v1661_v19, %v1645_v54 }
 0x7e0   : > { %v1648_v47 = vsub.bf16 1065369472, %v1640_v42  ;;  %v1677_v48 = vadd.bf16 1065369472, %v1669_v31  ;;  %v1671_v56 = vsel %vm1655_vm7, %v1663_v22, %v1647_v46 }
 0x7e1   : > { %v1670_v13 = vsel %vm1654_vm6, %v1662_v41, %v1646_v16  ;;  %v1679_v63 = vadd.bf16 1065369472, %v1671_v56 }
 0x7e2   : > { %v1678_v14 = vadd.bf16 1065369472, %v1670_v13  ;;  %v1664_v51 = vsub.bf16 0, %v1648_v47  ;;  %v1685_v37 = vmul.bf16 %v1677_v48, %v1469_v0 }
 0x7e3   : > { %v1687_v11 = vmul.bf16 %v1679_v63, %v1471_v3 }
 0x7e4   : > { %v1686_v39 = vmul.bf16 %v1678_v14, %v1470_v49  ;;  %v1672_v45 = vsel %vm1656_vm8, %v1664_v51, %v1648_v47 }
 0x7e5   : > { %v1680_v36 = vadd.bf16 1065369472, %v1672_v45 }
 0x7e6   : > { %1992 = vmatprep.mubr.bf16.mxu0 %v1686_v39 }
 0x7e7   : > { %1993 = vmatmul.mubr.bf16.gmra.mrb[28].mxu0 %v1685_v37  ;;  %v1688_v34 = vmul.bf16 %v1680_v36, %v1472_v53 }
 0x7e9   : > { %2041 = vmatprep.mubr.bf16.mxu1 %v1688_v34 }
 0x7ea   : > { %2042 = vmatmul.mubr.bf16.gmra.mrb[20].mxu1 %v1687_v11 }
 0x8ad   : > { %v2365_v32 = vpop.f32.mrb[24].mxu0 }
 0x8ae   : > { %v2393_v38 = vpop.f32.mrb[16].mxu1  ;;  %v2366_v40 = vpop.f32.mrb[25].mxu0 }
 0x8af   : > { %v2394_v30 = vpop.f32.mrb[17].mxu1  ;;  %v2367_v2 = vadd.f32 %v2366_v40, %v2365_v32  ;;  %v2368_v50 = vpop.f32.mrb[26].mxu0 }
 0x8b0   : > { %v2395_v35 = vadd.f32 %v2394_v30, %v2393_v38  ;;  %v2396_v59 = vpop.f32.mrb[18].mxu1  ;;  %v2369_v57 = vpop.f32.mrb[27].mxu0 }
 0x8b1   : > { %v2397_v33 = vpop.f32.mrb[19].mxu1  ;;  %v1987_v43 = vadd.f32 %v2367_v2, %v2281_v52  ;;  %v2370_v9 = vadd.f32 %v2369_v57, %v2368_v50 }
 0x8b2   : > { %v2398_v6 = vadd.f32 %v2397_v33, %v2396_v59 }
 0x8b3   : > { %v2036_v17 = vadd.f32 %v2395_v35, %v1987_v43  ;;  %v1990_v18 = vadd.f32 %v2370_v9, %v2281_v52 }
 0x8b5   : > { %v2050_v20 = vadd.f32 %v2036_v17, %v3393_v60  ;;  %v2039_v21 = vadd.f32 %v2398_v6, %v1990_v18 }
 0x8b7   : > { %2054 = vst [vmem:[%s475_s29] sm:$0xff] %v2050_v20  ;;  %v2051_v12 = vadd.f32 %v2039_v21, %v3399_v8 }
 0x8b9   : > { %2055 = vst [vmem:[%s475_s29 + $0x8] sm:$0xff] %v2051_v12 }
 0x8ba   : > { %v2371_v23 = vpop.f32.mrb[28].mxu0 }
 0x8bb   : > { %v2372_v24 = vpop.f32.mrb[29].mxu0 }
 0x8bc   : > { %v2373_v25 = vadd.f32 %v2372_v24, %v2371_v23  ;;  %v2374_v58 = vpop.f32.mrb[30].mxu0 }
 0x8bd   : > { %v2375_v26 = vpop.f32.mrb[31].mxu0  ;;  %v2399_v27 = vpop.f32.mrb[20].mxu1 }
 0x8be   : > { %v1995_v28 = vadd.f32 %v2373_v25, %v2281_v52  ;;  %v2376_v55 = vadd.f32 %v2375_v26, %v2374_v58  ;;  %v2400_v61 = vpop.f32.mrb[21].mxu1 }
 0x8bf   : > { %v2401_v62 = vadd.f32 %v2400_v61, %v2399_v27  ;;  %v2402_v60 = vpop.f32.mrb[22].mxu1 }
 0x8c0   : > { %v1998_v4 = vadd.f32 %v2376_v55, %v2281_v52  ;;  %v2403_v1 = vpop.f32.mrb[23].mxu1 }
 0x8c1   : > { %v2044_v15 = vadd.f32 %v2401_v62, %v1995_v28  ;;  %v2404_v8 = vadd.f32 %v2403_v1, %v2402_v60 }
 0x8c3   : > { %v2052_v29 = vadd.f32 %v2044_v15, %v3396_v7  ;;  %v2047_v54 = vadd.f32 %v2404_v8, %v1998_v4 }
 0x8c5   : > { %2056 = vst [vmem:[%s475_s29 + $0x10] sm:$0xff] %v2052_v29  ;;  %v2053_v46 = vadd.f32 %v2047_v54, %v3404_v10 }
 0x8c7   : > { %2057 = vst [vmem:[%s475_s29 + $0x18] sm:$0xff] %v2053_v46 }
 0x8c8   : > { %2936 = shalt.err (!%p2933_p8)
}
 0x8c9   : > { %s2937_s26 = scalar_lea.hbm %s3610_s27, 512  ;;  %s2941_s28 = scalar_lea.hbm %s3703_s12, 1024 }
 0x8ca   : > { %p2938_p6 = scmp.ne.s32.totalorder %s3610_s27, %s2937_s26  ;;  %p2942_p3 = scmp.lt.u32.totalorder %s3610_s27, %s3703_s12 }
 0x8cb   : > { %p2943_p5 = scmp.lt.u32.totalorder %s2941_s28, %s2937_s26  ;;  %p2945_p7 = scmp.lt.u32.totalorder %s2937_s26, %s3610_s27 }
 0x8cc   : > { %p2939_p11 = pnand %p2938_p6, %p3704_p10 }
 0x8cd   : > { %p2944_p9 = por %p2943_p5, %p2942_p3 }
 0x8ce   : > { %p2940_p12 = pneg %p2939_p11 }
 0x8cf   : > { %p2946_p4 = por %p2945_p7, %p2944_p9 }
 0x8d1   : > { %p2947_p1 = pnand %p2946_p4, %p2940_p12 }
 0x8d3   : > { %2950 = shalt.err (!%p2947_p1)
}
 0x8d4   : > { %s3019_s11 = smov 128   ;;  %s3020_s15 = smov 8  }
 0x8d5   : > { %2483 = dma.vmem_to_hbm [thread:$0]  (%p3704_p10), %s3604_s30, 512, %s3610_s27, %s2059_s1, %s3019_s11, %s3019_s11, %s3020_s15  }
 0x8d6 PF: > { %s2087_s25 = sand.u32 1, %s2989_s17   ;;  %p3705_p13 = scmp.ne.s32.totalorder %s3686_s22, 0 }
 0x8d7   : > { %p3706_p0 = scmp.ge.s32.totalorder %s3001_s20, 2  ;;  %s2088_s26 = scalar_lea.sflag [#allocation4], %s2087_s25 }
 0x8d9   : > { %p2506_p2 = pnand %p3706_p0, %p3705_p13 }
 0x8db   : > { %2984 = dma.done.wait (!%p2506_p2), %s2088_s26, 512  }
 0x8dc   : > { %2986 = vsyncadd (!%p2506_p2), %s2088_s26, 4294966784  ;;  %p27_p8 = scmp.ge.s32.totalorder %s3246_s16, 4   ;;  %s3707_s17 = smov %s2993_s18 }
 0x8dd   : > { %s3708_s18 = smov %s2997_s19  ;;  %s3709_s19 = smov %s3258_s21 }
 0x8de   : > { %s3710_s20 = smov %s3246_s16  ;;  %29 = sbr.rel (!%p27_p8) target bundleno = 12 (0xc), region = 129 }
 0x8e5   :  { %2093 = vsyncpa [#allocation3], 1 }
 0x8e6   :  { %2095 = vsyncpa [#allocation3 + $0x1], 1 }
 0x8e7   :  { %2096 = vsyncpa [#allocation6], 1 }
 0x8e8   :  { %2097 = vsyncpa [#allocation9], 1 }
 0x8e9   :  { %2098 = vsyncpa [#allocation12], 1 }
 0x8ea   :  { %2099 = vsyncpa [#allocation4], 1 }
 0x8eb   :  { %2101 = vsyncpa [#allocation4 + $0x1], 1 }

</bundles_post_ra>
